<compile_context>
chip_gen: v7x
topology: tpu7x:2x2x1
jax: 0.10.0
libtpu: 0.0.40
codegen_flags: <defaults>
</compile_context>

<pallas_src>
import math
import functools

import jax
import jax.numpy as jnp
from jax.experimental import pallas as pl
from jax.experimental.pallas import tpu as pltpu


def _round_up(v, m):
    return -(-v // m) * m


def _physical_vmem_bytes():
    """Physical VMEM of the local chip; conservative 64 MiB (v7x) fallback."""
    try:
        info = pltpu.get_tpu_info()
        for name in ("vmem_capacity_bytes", "vmem_size_bytes", "vmem_bytes"):
            v = getattr(info, name, None)
            if v:
                return int(v)
    except Exception:
        pass
    return 64 * 1024 * 1024


def _estimate_vmem_bytes(T, d, H, K, Tq, itemsize, weight_buffers=2):
    """Rough per-grid-step VMEM footprint: pipeline buffers + scratch + live temporaries."""
    Tp, Tqp = _round_up(T, 8), _round_up(Tq, 8)
    Kp, dp, Tl = _round_up(K, 128), _round_up(d, 128), _round_up(T, 128)
    b = 0
    b += 2 * Tp * dp * itemsize                                   # x block (double-buffered)
    b += 2 * Tqp * dp * itemsize                                  # out block (double-buffered)
    b += weight_buffers * (4 * dp * dp + 4 * 8 * dp) * itemsize   # Wq/Wk/Wv/Wproj + biases
    b += (H * Tqp * Kp + 2 * H * Tp * Kp + Tqp * dp) * itemsize   # q3/k3/v3/ctx2 scratch
    b += 2 * H * Tqp * Tl * 4                                     # scores s + exp(e), f32
    b += H * Tqp * Tl * itemsize                                  # probabilities p (MXU dtype)
    b += H * Tqp * Kp * 4                                         # context (f32)
    return b


def _pick_q_tile(T, d, H, K, itemsize, budget):
    """Largest query tile (divisor of T, multiple of 8, or T itself) fitting the VMEM
    budget; prefers MXU/lane-friendly multiples of 256 then 128."""
    if _estimate_vmem_bytes(T, d, H, K, T, itemsize) <= budget:
        return T
    divs = [t for t in range(8, T, 8) if T % t == 0]
    for pref in (lambda t: t % 256 == 0, lambda t: t % 128 == 0, lambda t: True):
        for t in sorted(divs, reverse=True):
            if pref(t) and _estimate_vmem_bytes(T, d, H, K, t, itemsize) <= budget:
                return t
    return divs[0] if divs else T


def _attn_kernel(x_ref, wq_ref, wk_ref, wv_ref, bq_ref, bk_ref, bv_ref,
                 wproj_ref, bproj_ref, o_ref,
                 q3_ref, k3_ref, v3_ref, ctx2_ref, *, H, K, Tq):
    """One grid step = (one batch row, one query tile).

    x_ref     : (T, d)          VMEM (full sequence; block index constant across qi)
    wq/wk/wv  : (d, d)          VMEM (resident weights)
    bq/bk/bv  : (1, d)          VMEM
    wproj     : (d, d)          VMEM, bproj: (1, d)
    o_ref     : (Tq, d)         VMEM
    q3_ref    : (H, Tq, K)      VMEM scratch (head-major Q, per query tile)
    k3_ref    : (H, T,  K)      VMEM scratch (head-major K, cached per batch row)
    v3_ref    : (H, T,  K)      VMEM scratch (head-major V, cached per batch row)
    ctx2_ref  : (Tq, d)         VMEM scratch (head-concat slab)
    """
    T, d = x_ref.shape
    cdt = x_ref.dtype                    # MXU operand dtype (bf16 stays bf16, f32 stays f32)
    qi = pl.program_id(1)
    scale = 1.0 / math.sqrt(K)

    # --- K / V projection + head-major staging: ONCE per batch row, cached in scratch. ---
    @pl.when(qi == 0)
    def _():
        x_full = x_ref[...]                                                   # (T, d)
        k2 = (jnp.dot(x_full, wk_ref[...], preferred_element_type=jnp.float32)
              + bk_ref[...]).astype(cdt)
        v2 = (jnp.dot(x_full, wv_ref[...], preferred_element_type=jnp.float32)
              + bv_ref[...]).astype(cdt)
        for hh in range(H):
            sl = slice(hh * K, (hh + 1) * K)
            k3_ref[hh] = k2[:, sl]
            v3_ref[hh] = v2[:, sl]

    # --- Q projection for this query tile only. ---
    if Tq == T:                                                    # static branch
        x_q = x_ref[...]
    else:
        x_q = x_ref[pl.ds(pl.multiple_of(qi * Tq, Tq), Tq), :]     # (Tq, d)
    q2 = (jnp.dot(x_q, wq_ref[...], preferred_element_type=jnp.float32)
          + bq_ref[...]) * scale          # fold 1/sqrt(K) into q: O(Tq*d), not O(H*Tq*T)
    q2 = q2.astype(cdt)
    for hh in range(H):
        q3_ref[hh] = q2[:, hh * K:(hh + 1) * K]

    q3 = q3_ref[...]                     # (H, Tq, K)
    k3 = k3_ref[...]                     # (H, T,  K)  (cached)
    v3 = v3_ref[...]                     # (H, T,  K)  (cached)

    # --- Attention: heads batched on the leading dim, one dot_general each. ---
    s = jnp.einsum('hqk,hmk->hqm', q3, k3,
                   preferred_element_type=jnp.float32)             # (H, Tq, T) f32

    # Numerically-stable softmax, kept in f32 (v5e has no bf16 VPU/EUP path).
    m = jnp.max(s, axis=-1, keepdims=True)
    e = jnp.exp(s - m)
    denom = jnp.sum(e, axis=-1, keepdims=True)
    p = (e * pl.reciprocal(denom, approx=True)).astype(cdt)        # probs back to MXU dtype
    # TODO(synk): dropout on p is identity here (eval mode).

    ctx = jnp.einsum('hqm,hmk->hqk', p, v3,
                     preferred_element_type=jnp.float32)           # (H, Tq, K) f32

    # Head concat == torch transpose(1,2).reshape: plain lane-slab stores, no concatenate.
    for hh in range(H):
        ctx2_ref[:, hh * K:(hh + 1) * K] = ctx[hh].astype(cdt)

    out = jnp.dot(ctx2_ref[...], wproj_ref[...],
                  preferred_element_type=jnp.float32) + bproj_ref[...]
    o_ref[...] = out.astype(o_ref.dtype)


def attn_pallas(x, w_qkv, b_qkv, w_proj, b_proj, *, h):
    B, T, d = x.shape
    assert d % h == 0
    k = d // h
    itemsize = x.dtype.itemsize

    # Split the fused QKV parameters once, outside the kernel, so the kernel never
    # lane-slices a (T, 3d) activation.
    w_q, w_k, w_v = w_qkv[:, :d], w_qkv[:, d:2 * d], w_qkv[:, 2 * d:]
    b_q, b_k, b_v = b_qkv[:, :d], b_qkv[:, d:2 * d], b_qkv[:, 2 * d:]

    # --- VMEM budgeting (formula-capped query tile; v7x-safe 64 MiB fallback). ---
    phys = _physical_vmem_bytes()
    vmem_limit = max(min(int(phys * 0.75), phys - (12 << 20)), 32 << 20)
    budget = vmem_limit - (6 << 20)                  # headroom for compiler scratch
    tq = _pick_q_tile(T, d, h, k, itemsize, budget)
    est = _estimate_vmem_bytes(T, d, h, k, tq, itemsize)
    vmem_limit = max(vmem_limit, min(est + (8 << 20), phys - (4 << 20)))

    nq = T // tq
    grid = (B, nq)
    kernel = functools.partial(_attn_kernel, H=h, K=k, Tq=tq)

    # Advisory cost (K/V projected once per batch row, no staging recompute).
    flops = int(2 * B * T * d * (3 * d) + 4 * B * T * T * d + 2 * B * T * d * d)
    transcendentals = int(B * h * T * T)
    bytes_accessed = int(2 * B * T * d * itemsize
                         + (w_qkv.size + b_qkv.size + w_proj.size + b_proj.size)
                         * w_qkv.dtype.itemsize)

    args = (x, w_q, w_k, w_v, b_q, b_k, b_v, w_proj, b_proj)

    def build(single_buffer_weights):
        pipeline_mode = None
        if single_buffer_weights and hasattr(pl, "Buffered"):
            pipeline_mode = pl.Buffered(1)           # resident operands: no double buffer

        def resident(shape):
            zeros = (0,) * len(shape)
            if pipeline_mode is None:
                return pl.BlockSpec(shape, lambda b_, qi_: zeros)
            return pl.BlockSpec(shape, lambda b_, qi_: zeros, pipeline_mode=pipeline_mode)

        return pl.pallas_call(
            kernel,
            out_shape=jax.ShapeDtypeStruct((B, T, d), x.dtype),
            grid_spec=pltpu.PrefetchScalarGridSpec(
                num_scalar_prefetch=0,
                grid=grid,
                in_specs=[
                    # x: full sequence per batch row; block index constant across the query
                    # axis, so it is fetched once per batch row, not per query tile.
                    pl.BlockSpec((None, T, d), lambda b_, qi_: (b_, 0, 0)),
                    resident((d, d)),          # W_q  (resident weight)
                    resident((d, d)),          # W_k
                    resident((d, d)),          # W_v
                    resident((1, d)),          # b_q
                    resident((1, d)),          # b_k
                    resident((1, d)),          # b_v
                    resident((d, d)),          # W_proj
                    resident((1, d)),          # b_proj
                ],
                out_specs=pl.BlockSpec((None, tq, d), lambda b_, qi_: (b_, qi_, 0)),
                scratch_shapes=[
                    pltpu.VMEM((h, tq, k), x.dtype),   # Q, head-major (per query tile)
                    pltpu.VMEM((h, T, k), x.dtype),    # K, head-major (cached per batch row)
                    pltpu.VMEM((h, T, k), x.dtype),    # V, head-major (cached per batch row)
                    pltpu.VMEM((tq, d), x.dtype),      # head-concat context slab
                ],
            ),
            compiler_params=pltpu.CompilerParams(
                # Batch axis parallel (v7x: 2 TCs split over B).  The query axis must be
                # "arbitrary" (sequential) so qi==0 fills the K/V cache before other tiles.
                dimension_semantics=("parallel", "arbitrary"),
                vmem_limit_bytes=int(vmem_limit),
            ),
            cost_estimate=pl.CostEstimate(flops=flops,
                                          transcendentals=transcendentals,
                                          bytes_accessed=bytes_accessed),
        )

    try:
        return jax.block_until_ready(build(True)(*args))
    except Exception:
        # pl.Buffered(1) not supported by this JAX/Mosaic build: fall back to default
        # double-buffered specs (only costs extra VMEM for the resident weights).
        return build(False)(*args)


def attn_reference(x, w_qkv, b_qkv, w_proj, b_proj, *, h):
    """Pure-JAX reference mirroring the PyTorch forward (dropout = identity)."""
    B, T, d = x.shape
    k = d // h
    qkv = x @ w_qkv + b_qkv[0]                              # (B, T, 3d)
    qkv = qkv.reshape(B, T, 3, h, k)
    q, kk, v = jnp.moveaxis(qkv, 2, 0)                      # each (B, T, h, k)
    q = jnp.transpose(q, (0, 2, 1, 3))                      # (B, h, T, k)
    kk = jnp.transpose(kk, (0, 2, 1, 3))
    v = jnp.transpose(v, (0, 2, 1, 3))
    s = jnp.einsum('bhqk,bhmk->bhqm', q, kk) / math.sqrt(k)
    a = jax.nn.softmax(s, axis=-1)
    ctx = jnp.einsum('bhqm,bhmk->bhqk', a, v)               # (B, h, T, k)
    ctx = jnp.transpose(ctx, (0, 2, 1, 3)).reshape(B, T, d)
    return ctx @ w_proj + b_proj[0]


if __name__ == "__main__":
    # Small shapes consistent with the module: B=2, T=8, d=32, h=4 (k=8).
    B, T, D, H = 2, 8, 32, 4

    key = jax.random.PRNGKey(0)
    kx, kw1, kb1, kw2, kb2 = jax.random.split(key, 5)

    x = jax.random.normal(kx, (B, T, D), dtype=jnp.float32)

    # Deterministic Linear params (stored (in, out); biases kept 2-D for VMEM friendliness).
    bound_qkv = 1.0 / math.sqrt(D)
    w_qkv = jax.random.uniform(kw1, (D, 3 * D), jnp.float32, -bound_qkv, bound_qkv)
    b_qkv = jax.random.uniform(kb1, (1, 3 * D), jnp.float32, -bound_qkv, bound_qkv)
    bound_proj = 1.0 / math.sqrt(D)
    w_proj = jax.random.uniform(kw2, (D, D), jnp.float32, -bound_proj, bound_proj)
    b_proj = jax.random.uniform(kb2, (1, D), jnp.float32, -bound_proj, bound_proj)

    out = attn_pallas(x, w_qkv, b_qkv, w_proj, b_proj, h=H)
    out = jax.block_until_ready(out)

    ref = attn_reference(x, w_qkv, b_qkv, w_proj, b_proj, h=H)
    assert out.shape == (B, T, D)
    # Tolerance accounts for the approximate (EUP) reciprocal in the softmax normalisation.
    assert jnp.allclose(out, ref, atol=2e-3, rtol=2e-3), "Pallas output mismatch vs reference"

    print("KERNEL_OK")
</pallas_src>

<mosaic_0001>
module attributes {stable_mosaic.version = 11 : i64} {
  func.func @_attn_kernel(%arg0: i32, %arg1: i32, %arg2: memref<1x8x32xf32, #tpu.memory_space<vmem>>, %arg3: memref<32x32xf32, #tpu.memory_space<vmem>>, %arg4: memref<32x32xf32, #tpu.memory_space<vmem>>, %arg5: memref<32x32xf32, #tpu.memory_space<vmem>>, %arg6: memref<1x32xf32, #tpu.memory_space<vmem>>, %arg7: memref<1x32xf32, #tpu.memory_space<vmem>>, %arg8: memref<1x32xf32, #tpu.memory_space<vmem>>, %arg9: memref<32x32xf32, #tpu.memory_space<vmem>>, %arg10: memref<1x32xf32, #tpu.memory_space<vmem>>, %arg11: memref<1x8x32xf32, #tpu.memory_space<vmem>>, %arg12: memref<4x8x8xf32, #tpu.memory_space<vmem>>, %arg13: memref<4x8x8xf32, #tpu.memory_space<vmem>>, %arg14: memref<4x8x8xf32, #tpu.memory_space<vmem>>, %arg15: memref<8x32xf32, #tpu.memory_space<vmem>>) attributes {dimension_semantics = [#tpu.dimension_semantics<parallel>, #tpu.dimension_semantics<arbitrary>], iteration_bounds = array<i64: 2, 1>, scalar_prefetch = 0 : i64, scratch_operands = 4 : i64, tpu.core_type = #tpu.core_type<tc>, window_params = [{transform_indices = @transform_0, window_bounds = array<i64: 1, 8, 32>}, {pipeline_mode = #tpu.pipeline_mode<synchronous>, transform_indices = @transform_1, window_bounds = array<i64: 32, 32>}, {pipeline_mode = #tpu.pipeline_mode<synchronous>, transform_indices = @transform_2, window_bounds = array<i64: 32, 32>}, {pipeline_mode = #tpu.pipeline_mode<synchronous>, transform_indices = @transform_3, window_bounds = array<i64: 32, 32>}, {pipeline_mode = #tpu.pipeline_mode<synchronous>, transform_indices = @transform_4, window_bounds = array<i64: 1, 32>}, {pipeline_mode = #tpu.pipeline_mode<synchronous>, transform_indices = @transform_5, window_bounds = array<i64: 1, 32>}, {pipeline_mode = #tpu.pipeline_mode<synchronous>, transform_indices = @transform_6, window_bounds = array<i64: 1, 32>}, {pipeline_mode = #tpu.pipeline_mode<synchronous>, transform_indices = @transform_7, window_bounds = array<i64: 32, 32>}, {pipeline_mode = #tpu.pipeline_mode<synchronous>, transform_indices = @transform_8, window_bounds = array<i64: 1, 32>}, {transform_indices = @transform_9, window_bounds = array<i64: 1, 8, 32>}]} {
    %c0_i32 = arith.constant 0 : i32
    %0 = arith.cmpi eq, %arg1, %c0_i32 : i32
    %1 = arith.extui %0 : i1 to i32
    %c0_i32_0 = arith.constant 0 : i32
    %2 = arith.cmpi ne, %1, %c0_i32_0 : i32
    scf.if %2 {
      %c0_45 = arith.constant 0 : index
      %c0_46 = arith.constant 0 : index
      %c0_47 = arith.constant 0 : index
      %64 = vector.load %arg2[%c0_45, %c0_46, %c0_47] : memref<1x8x32xf32, #tpu.memory_space<vmem>>, vector<1x8x32xf32>
      %65 = vector.shape_cast %64 : vector<1x8x32xf32> to vector<8x32xf32>
      %c0_48 = arith.constant 0 : index
      %c0_49 = arith.constant 0 : index
      %66 = vector.load %arg4[%c0_48, %c0_49] : memref<32x32xf32, #tpu.memory_space<vmem>>, vector<32x32xf32>
      %cst_50 = arith.constant dense<0.000000e+00> : vector<8x32xf32>
      %67 = tpu.matmul %65, %66, %cst_50 {dimension_numbers = #tpu.dot_dimension_numbers<[1], [0], [0], [1], [0, 0, 1, 1], [], []>} : vector<8x32xf32>, vector<32x32xf32>, vector<8x32xf32> -> vector<8x32xf32>
      %c0_51 = arith.constant 0 : index
      %c0_52 = arith.constant 0 : index
      %68 = vector.load %arg7[%c0_51, %c0_52] : memref<1x32xf32, #tpu.memory_space<vmem>>, vector<1x32xf32>
      %69 = vector.broadcast %68 : vector<1x32xf32> to vector<8x32xf32>
      %70 = arith.addf %67, %69 : vector<8x32xf32>
      %c0_53 = arith.constant 0 : index
      %c0_54 = arith.constant 0 : index
      %71 = vector.load %arg5[%c0_53, %c0_54] : memref<32x32xf32, #tpu.memory_space<vmem>>, vector<32x32xf32>
      %cst_55 = arith.constant dense<0.000000e+00> : vector<8x32xf32>
      %72 = tpu.matmul %65, %71, %cst_55 {dimension_numbers = #tpu.dot_dimension_numbers<[1], [0], [0], [1], [0, 0, 1, 1], [], []>} : vector<8x32xf32>, vector<32x32xf32>, vector<8x32xf32> -> vector<8x32xf32>
      %c0_56 = arith.constant 0 : index
      %c0_57 = arith.constant 0 : index
      %73 = vector.load %arg8[%c0_56, %c0_57] : memref<1x32xf32, #tpu.memory_space<vmem>>, vector<1x32xf32>
      %74 = vector.broadcast %73 : vector<1x32xf32> to vector<8x32xf32>
      %75 = arith.addf %72, %74 : vector<8x32xf32>
      %76 = vector.extract_strided_slice %70 {offsets = [0, 0], sizes = [8, 8], strides = [1, 1]} : vector<8x32xf32> to vector<8x8xf32>
      %c0_58 = arith.constant 0 : index
      %c0_59 = arith.constant 0 : index
      %c0_60 = arith.constant 0 : index
      %77 = vector.load %arg13[%c0_58, %c0_59, %c0_60] : memref<4x8x8xf32, #tpu.memory_space<vmem>>, vector<1x8x8xf32>
      %78 = vector.shape_cast %77 : vector<1x8x8xf32> to vector<8x8xf32>
      %79 = vector.shape_cast %76 : vector<8x8xf32> to vector<1x8x8xf32>
      tpu.vector_store %arg13[%c0_58, %c0_59, %c0_60], %79 {strides = array<i32>} : memref<4x8x8xf32, #tpu.memory_space<vmem>>, vector<1x8x8xf32>,
      %80 = vector.extract_strided_slice %75 {offsets = [0, 0], sizes = [8, 8], strides = [1, 1]} : vector<8x32xf32> to vector<8x8xf32>
      %c0_61 = arith.constant 0 : index
      %c0_62 = arith.constant 0 : index
      %c0_63 = arith.constant 0 : index
      %81 = vector.load %arg14[%c0_61, %c0_62, %c0_63] : memref<4x8x8xf32, #tpu.memory_space<vmem>>, vector<1x8x8xf32>
      %82 = vector.shape_cast %81 : vector<1x8x8xf32> to vector<8x8xf32>
      %83 = vector.shape_cast %80 : vector<8x8xf32> to vector<1x8x8xf32>
      tpu.vector_store %arg14[%c0_61, %c0_62, %c0_63], %83 {strides = array<i32>} : memref<4x8x8xf32, #tpu.memory_space<vmem>>, vector<1x8x8xf32>,
      %84 = vector.extract_strided_slice %70 {offsets = [0, 8], sizes = [8, 8], strides = [1, 1]} : vector<8x32xf32> to vector<8x8xf32>
      %c1_64 = arith.constant 1 : index
      %c0_65 = arith.constant 0 : index
      %c0_66 = arith.constant 0 : index
      %85 = vector.load %arg13[%c1_64, %c0_65, %c0_66] : memref<4x8x8xf32, #tpu.memory_space<vmem>>, vector<1x8x8xf32>
      %86 = vector.shape_cast %85 : vector<1x8x8xf32> to vector<8x8xf32>
      %87 = vector.shape_cast %84 : vector<8x8xf32> to vector<1x8x8xf32>
      tpu.vector_store %arg13[%c1_64, %c0_65, %c0_66], %87 {strides = array<i32>} : memref<4x8x8xf32, #tpu.memory_space<vmem>>, vector<1x8x8xf32>,
      %88 = vector.extract_strided_slice %75 {offsets = [0, 8], sizes = [8, 8], strides = [1, 1]} : vector<8x32xf32> to vector<8x8xf32>
      %c1_67 = arith.constant 1 : index
      %c0_68 = arith.constant 0 : index
      %c0_69 = arith.constant 0 : index
      %89 = vector.load %arg14[%c1_67, %c0_68, %c0_69] : memref<4x8x8xf32, #tpu.memory_space<vmem>>, vector<1x8x8xf32>
      %90 = vector.shape_cast %89 : vector<1x8x8xf32> to vector<8x8xf32>
      %91 = vector.shape_cast %88 : vector<8x8xf32> to vector<1x8x8xf32>
      tpu.vector_store %arg14[%c1_67, %c0_68, %c0_69], %91 {strides = array<i32>} : memref<4x8x8xf32, #tpu.memory_space<vmem>>, vector<1x8x8xf32>,
      %92 = vector.extract_strided_slice %70 {offsets = [0, 16], sizes = [8, 8], strides = [1, 1]} : vector<8x32xf32> to vector<8x8xf32>
      %c2_70 = arith.constant 2 : index
      %c0_71 = arith.constant 0 : index
      %c0_72 = arith.constant 0 : index
      %93 = vector.load %arg13[%c2_70, %c0_71, %c0_72] : memref<4x8x8xf32, #tpu.memory_space<vmem>>, vector<1x8x8xf32>
      %94 = vector.shape_cast %93 : vector<1x8x8xf32> to vector<8x8xf32>
      %95 = vector.shape_cast %92 : vector<8x8xf32> to vector<1x8x8xf32>
      tpu.vector_store %arg13[%c2_70, %c0_71, %c0_72], %95 {strides = array<i32>} : memref<4x8x8xf32, #tpu.memory_space<vmem>>, vector<1x8x8xf32>,
      %96 = vector.extract_strided_slice %75 {offsets = [0, 16], sizes = [8, 8], strides = [1, 1]} : vector<8x32xf32> to vector<8x8xf32>
      %c2_73 = arith.constant 2 : index
      %c0_74 = arith.constant 0 : index
      %c0_75 = arith.constant 0 : index
      %97 = vector.load %arg14[%c2_73, %c0_74, %c0_75] : memref<4x8x8xf32, #tpu.memory_space<vmem>>, vector<1x8x8xf32>
      %98 = vector.shape_cast %97 : vector<1x8x8xf32> to vector<8x8xf32>
      %99 = vector.shape_cast %96 : vector<8x8xf32> to vector<1x8x8xf32>
      tpu.vector_store %arg14[%c2_73, %c0_74, %c0_75], %99 {strides = array<i32>} : memref<4x8x8xf32, #tpu.memory_space<vmem>>, vector<1x8x8xf32>,
      %100 = vector.extract_strided_slice %70 {offsets = [0, 24], sizes = [8, 8], strides = [1, 1]} : vector<8x32xf32> to vector<8x8xf32>
      %c3_76 = arith.constant 3 : index
      %c0_77 = arith.constant 0 : index
      %c0_78 = arith.constant 0 : index
      %101 = vector.load %arg13[%c3_76, %c0_77, %c0_78] : memref<4x8x8xf32, #tpu.memory_space<vmem>>, vector<1x8x8xf32>
      %102 = vector.shape_cast %101 : vector<1x8x8xf32> to vector<8x8xf32>
      %103 = vector.shape_cast %100 : vector<8x8xf32> to vector<1x8x8xf32>
      tpu.vector_store %arg13[%c3_76, %c0_77, %c0_78], %103 {strides = array<i32>} : memref<4x8x8xf32, #tpu.memory_space<vmem>>, vector<1x8x8xf32>,
      %104 = vector.extract_strided_slice %75 {offsets = [0, 24], sizes = [8, 8], strides = [1, 1]} : vector<8x32xf32> to vector<8x8xf32>
      %c3_79 = arith.constant 3 : index
      %c0_80 = arith.constant 0 : index
      %c0_81 = arith.constant 0 : index
      %105 = vector.load %arg14[%c3_79, %c0_80, %c0_81] : memref<4x8x8xf32, #tpu.memory_space<vmem>>, vector<1x8x8xf32>
      %106 = vector.shape_cast %105 : vector<1x8x8xf32> to vector<8x8xf32>
      %107 = vector.shape_cast %104 : vector<8x8xf32> to vector<1x8x8xf32>
      tpu.vector_store %arg14[%c3_79, %c0_80, %c0_81], %107 {strides = array<i32>} : memref<4x8x8xf32, #tpu.memory_space<vmem>>, vector<1x8x8xf32>,
    } else {
    }
    %c0 = arith.constant 0 : index
    %c0_1 = arith.constant 0 : index
    %c0_2 = arith.constant 0 : index
    %3 = vector.load %arg2[%c0, %c0_1, %c0_2] : memref<1x8x32xf32, #tpu.memory_space<vmem>>, vector<1x8x32xf32>
    %4 = vector.shape_cast %3 : vector<1x8x32xf32> to vector<8x32xf32>
    %c0_3 = arith.constant 0 : index
    %c0_4 = arith.constant 0 : index
    %5 = vector.load %arg3[%c0_3, %c0_4] : memref<32x32xf32, #tpu.memory_space<vmem>>, vector<32x32xf32>
    %cst = arith.constant dense<0.000000e+00> : vector<8x32xf32>
    %6 = tpu.matmul %4, %5, %cst {dimension_numbers = #tpu.dot_dimension_numbers<[1], [0], [0], [1], [0, 0, 1, 1], [], []>} : vector<8x32xf32>, vector<32x32xf32>, vector<8x32xf32> -> vector<8x32xf32>
    %c0_5 = arith.constant 0 : index
    %c0_6 = arith.constant 0 : index
    %7 = vector.load %arg6[%c0_5, %c0_6] : memref<1x32xf32, #tpu.memory_space<vmem>>, vector<1x32xf32>
    %8 = vector.broadcast %7 : vector<1x32xf32> to vector<8x32xf32>
    %9 = arith.addf %6, %8 : vector<8x32xf32>
    %cst_7 = arith.constant 0.353553385 : f32
    %10 = vector.broadcast %cst_7 : f32 to vector<8x32xf32>
    %11 = arith.mulf %9, %10 : vector<8x32xf32>
    %12 = vector.extract_strided_slice %11 {offsets = [0, 0], sizes = [8, 8], strides = [1, 1]} : vector<8x32xf32> to vector<8x8xf32>
    %c0_8 = arith.constant 0 : index
    %c0_9 = arith.constant 0 : index
    %c0_10 = arith.constant 0 : index
    %13 = vector.load %arg12[%c0_8, %c0_9, %c0_10] : memref<4x8x8xf32, #tpu.memory_space<vmem>>, vector<1x8x8xf32>
    %14 = vector.shape_cast %13 : vector<1x8x8xf32> to vector<8x8xf32>
    %15 = vector.shape_cast %12 : vector<8x8xf32> to vector<1x8x8xf32>
    tpu.vector_store %arg12[%c0_8, %c0_9, %c0_10], %15 {strides = array<i32>} : memref<4x8x8xf32, #tpu.memory_space<vmem>>, vector<1x8x8xf32>,
    %16 = vector.extract_strided_slice %11 {offsets = [0, 8], sizes = [8, 8], strides = [1, 1]} : vector<8x32xf32> to vector<8x8xf32>
    %c1 = arith.constant 1 : index
    %c0_11 = arith.constant 0 : index
    %c0_12 = arith.constant 0 : index
    %17 = vector.load %arg12[%c1, %c0_11, %c0_12] : memref<4x8x8xf32, #tpu.memory_space<vmem>>, vector<1x8x8xf32>
    %18 = vector.shape_cast %17 : vector<1x8x8xf32> to vector<8x8xf32>
    %19 = vector.shape_cast %16 : vector<8x8xf32> to vector<1x8x8xf32>
    tpu.vector_store %arg12[%c1, %c0_11, %c0_12], %19 {strides = array<i32>} : memref<4x8x8xf32, #tpu.memory_space<vmem>>, vector<1x8x8xf32>,
    %20 = vector.extract_strided_slice %11 {offsets = [0, 16], sizes = [8, 8], strides = [1, 1]} : vector<8x32xf32> to vector<8x8xf32>
    %c2 = arith.constant 2 : index
    %c0_13 = arith.constant 0 : index
    %c0_14 = arith.constant 0 : index
    %21 = vector.load %arg12[%c2, %c0_13, %c0_14] : memref<4x8x8xf32, #tpu.memory_space<vmem>>, vector<1x8x8xf32>
    %22 = vector.shape_cast %21 : vector<1x8x8xf32> to vector<8x8xf32>
    %23 = vector.shape_cast %20 : vector<8x8xf32> to vector<1x8x8xf32>
    tpu.vector_store %arg12[%c2, %c0_13, %c0_14], %23 {strides = array<i32>} : memref<4x8x8xf32, #tpu.memory_space<vmem>>, vector<1x8x8xf32>,
    %24 = vector.extract_strided_slice %11 {offsets = [0, 24], sizes = [8, 8], strides = [1, 1]} : vector<8x32xf32> to vector<8x8xf32>
    %c3 = arith.constant 3 : index
    %c0_15 = arith.constant 0 : index
    %c0_16 = arith.constant 0 : index
    %25 = vector.load %arg12[%c3, %c0_15, %c0_16] : memref<4x8x8xf32, #tpu.memory_space<vmem>>, vector<1x8x8xf32>
    %26 = vector.shape_cast %25 : vector<1x8x8xf32> to vector<8x8xf32>
    %27 = vector.shape_cast %24 : vector<8x8xf32> to vector<1x8x8xf32>
    tpu.vector_store %arg12[%c3, %c0_15, %c0_16], %27 {strides = array<i32>} : memref<4x8x8xf32, #tpu.memory_space<vmem>>, vector<1x8x8xf32>,
    %c0_17 = arith.constant 0 : index
    %c0_18 = arith.constant 0 : index
    %c0_19 = arith.constant 0 : index
    %28 = vector.load %arg12[%c0_17, %c0_18, %c0_19] : memref<4x8x8xf32, #tpu.memory_space<vmem>>, vector<4x8x8xf32>
    %c0_20 = arith.constant 0 : index
    %c0_21 = arith.constant 0 : index
    %c0_22 = arith.constant 0 : index
    %29 = vector.load %arg13[%c0_20, %c0_21, %c0_22] : memref<4x8x8xf32, #tpu.memory_space<vmem>>, vector<4x8x8xf32>
    %c0_23 = arith.constant 0 : index
    %c0_24 = arith.constant 0 : index
    %c0_25 = arith.constant 0 : index
    %30 = vector.load %arg14[%c0_23, %c0_24, %c0_25] : memref<4x8x8xf32, #tpu.memory_space<vmem>>, vector<4x8x8xf32>
    "tpu.trace_start"() <{level = 10 : i32, message = "hqk,hmk->hqm"}> : () -> ()
    %cst_26 = arith.constant dense<0.000000e+00> : vector<4x8x8xf32>
    %31 = tpu.matmul %28, %29, %cst_26 {dimension_numbers = #tpu.dot_dimension_numbers<[2], [2], [1], [1], [0, 0, 0, 1, 1, 1], [0], [0]>} : vector<4x8x8xf32>, vector<4x8x8xf32>, vector<4x8x8xf32> -> vector<4x8x8xf32>
    "tpu.trace_stop"() : () -> ()
    %cst_27 = arith.constant dense<0xFF800000> : vector<4x8xf32>
    %32 = vector.multi_reduction <maximumf>, %31, %cst_27 [2] : vector<4x8x8xf32> to vector<4x8xf32>
    %33 = vector.shape_cast %32 : vector<4x8xf32> to vector<4x8x1xf32>
    %34 = vector.broadcast %33 : vector<4x8x1xf32> to vector<4x8x8xf32>
    %35 = arith.subf %31, %34 : vector<4x8x8xf32>
    %36 = math.exp %35 : vector<4x8x8xf32>
    %cst_28 = arith.constant dense<0.000000e+00> : vector<4x8xf32>
    %37 = vector.multi_reduction <add>, %36, %cst_28 [2] : vector<4x8x8xf32> to vector<4x8xf32>
    %38 = vector.shape_cast %37 : vector<4x8xf32> to vector<4x8x1xf32>
    %39 = tpu.reciprocal %38 {approx = true} : vector<4x8x1xf32> -> vector<4x8x1xf32>
    %40 = vector.broadcast %39 : vector<4x8x1xf32> to vector<4x8x8xf32>
    %41 = arith.mulf %36, %40 : vector<4x8x8xf32>
    "tpu.trace_start"() <{level = 10 : i32, message = "hqm,hmk->hqk"}> : () -> ()
    %cst_29 = arith.constant dense<0.000000e+00> : vector<4x8x8xf32>
    %42 = tpu.matmul %41, %30, %cst_29 {dimension_numbers = #tpu.dot_dimension_numbers<[2], [1], [1], [2], [0, 0, 0, 1, 1, 2], [0], [0]>} : vector<4x8x8xf32>, vector<4x8x8xf32>, vector<4x8x8xf32> -> vector<4x8x8xf32>
    "tpu.trace_stop"() : () -> ()
    %43 = vector.extract_strided_slice %42 {offsets = [0, 0, 0], sizes = [1, 8, 8], strides = [1, 1, 1]} : vector<4x8x8xf32> to vector<1x8x8xf32>
    %44 = vector.shape_cast %43 : vector<1x8x8xf32> to vector<8x8xf32>
    %c0_30 = arith.constant 0 : index
    %c0_31 = arith.constant 0 : index
    %45 = vector.load %arg15[%c0_30, %c0_31] : memref<8x32xf32, #tpu.memory_space<vmem>>, vector<8x8xf32>
    tpu.vector_store %arg15[%c0_30, %c0_31], %44 {strides = array<i32>} : memref<8x32xf32, #tpu.memory_space<vmem>>, vector<8x8xf32>,
    %46 = vector.extract_strided_slice %42 {offsets = [1, 0, 0], sizes = [1, 8, 8], strides = [1, 1, 1]} : vector<4x8x8xf32> to vector<1x8x8xf32>
    %47 = vector.shape_cast %46 : vector<1x8x8xf32> to vector<8x8xf32>
    %c0_32 = arith.constant 0 : index
    %c8 = arith.constant 8 : index
    %48 = vector.load %arg15[%c0_32, %c8] : memref<8x32xf32, #tpu.memory_space<vmem>>, vector<8x8xf32>
    tpu.vector_store %arg15[%c0_32, %c8], %47 {strides = array<i32>} : memref<8x32xf32, #tpu.memory_space<vmem>>, vector<8x8xf32>,
    %49 = vector.extract_strided_slice %42 {offsets = [2, 0, 0], sizes = [1, 8, 8], strides = [1, 1, 1]} : vector<4x8x8xf32> to vector<1x8x8xf32>
    %50 = vector.shape_cast %49 : vector<1x8x8xf32> to vector<8x8xf32>
    %c0_33 = arith.constant 0 : index
    %c16 = arith.constant 16 : index
    %51 = vector.load %arg15[%c0_33, %c16] : memref<8x32xf32, #tpu.memory_space<vmem>>, vector<8x8xf32>
    tpu.vector_store %arg15[%c0_33, %c16], %50 {strides = array<i32>} : memref<8x32xf32, #tpu.memory_space<vmem>>, vector<8x8xf32>,
    %52 = vector.extract_strided_slice %42 {offsets = [3, 0, 0], sizes = [1, 8, 8], strides = [1, 1, 1]} : vector<4x8x8xf32> to vector<1x8x8xf32>
    %53 = vector.shape_cast %52 : vector<1x8x8xf32> to vector<8x8xf32>
    %c0_34 = arith.constant 0 : index
    %c24 = arith.constant 24 : index
    %54 = vector.load %arg15[%c0_34, %c24] : memref<8x32xf32, #tpu.memory_space<vmem>>, vector<8x8xf32>
    tpu.vector_store %arg15[%c0_34, %c24], %53 {strides = array<i32>} : memref<8x32xf32, #tpu.memory_space<vmem>>, vector<8x8xf32>,
    %c0_35 = arith.constant 0 : index
    %c0_36 = arith.constant 0 : index
    %55 = vector.load %arg15[%c0_35, %c0_36] : memref<8x32xf32, #tpu.memory_space<vmem>>, vector<8x32xf32>
    %c0_37 = arith.constant 0 : index
    %c0_38 = arith.constant 0 : index
    %56 = vector.load %arg9[%c0_37, %c0_38] : memref<32x32xf32, #tpu.memory_space<vmem>>, vector<32x32xf32>
    %cst_39 = arith.constant dense<0.000000e+00> : vector<8x32xf32>
    %57 = tpu.matmul %55, %56, %cst_39 {dimension_numbers = #tpu.dot_dimension_numbers<[1], [0], [0], [1], [0, 0, 1, 1], [], []>} : vector<8x32xf32>, vector<32x32xf32>, vector<8x32xf32> -> vector<8x32xf32>
    %c0_40 = arith.constant 0 : index
    %c0_41 = arith.constant 0 : index
    %58 = vector.load %arg10[%c0_40, %c0_41] : memref<1x32xf32, #tpu.memory_space<vmem>>, vector<1x32xf32>
    %59 = vector.broadcast %58 : vector<1x32xf32> to vector<8x32xf32>
    %60 = arith.addf %57, %59 : vector<8x32xf32>
    %c0_42 = arith.constant 0 : index
    %c0_43 = arith.constant 0 : index
    %c0_44 = arith.constant 0 : index
    %61 = vector.load %arg11[%c0_42, %c0_43, %c0_44] : memref<1x8x32xf32, #tpu.memory_space<vmem>>, vector<1x8x32xf32>
    %62 = vector.shape_cast %61 : vector<1x8x32xf32> to vector<8x32xf32>
    %63 = vector.shape_cast %60 : vector<8x32xf32> to vector<1x8x32xf32>
    tpu.vector_store %arg11[%c0_42, %c0_43, %c0_44], %63 {strides = array<i32>} : memref<1x8x32xf32, #tpu.memory_space<vmem>>, vector<1x8x32xf32>,
    return
  }
  func.func @transform_0(%arg0: i32, %arg1: i32) -> (i32, i32, i32) {
    %c0_i32 = arith.constant 0 : i32
    %c0_i32_0 = arith.constant 0 : i32
    %c0_i32_1 = arith.constant 0 : i32
    return %arg0, %c0_i32, %c0_i32_0 : i32, i32, i32
  }
  func.func @transform_1(%arg0: i32, %arg1: i32) -> (i32, i32) {
    %c0_i32 = arith.constant 0 : i32
    %c0_i32_0 = arith.constant 0 : i32
    %c0_i32_1 = arith.constant 0 : i32
    return %c0_i32, %c0_i32_0 : i32, i32
  }
  func.func @transform_2(%arg0: i32, %arg1: i32) -> (i32, i32) {
    %c0_i32 = arith.constant 0 : i32
    %c0_i32_0 = arith.constant 0 : i32
    %c0_i32_1 = arith.constant 0 : i32
    return %c0_i32, %c0_i32_0 : i32, i32
  }
  func.func @transform_3(%arg0: i32, %arg1: i32) -> (i32, i32) {
    %c0_i32 = arith.constant 0 : i32
    %c0_i32_0 = arith.constant 0 : i32
    %c0_i32_1 = arith.constant 0 : i32
    return %c0_i32, %c0_i32_0 : i32, i32
  }
  func.func @transform_4(%arg0: i32, %arg1: i32) -> (i32, i32) {
    %c0_i32 = arith.constant 0 : i32
    %c0_i32_0 = arith.constant 0 : i32
    %c0_i32_1 = arith.constant 0 : i32
    return %c0_i32, %c0_i32_0 : i32, i32
  }
  func.func @transform_5(%arg0: i32, %arg1: i32) -> (i32, i32) {
    %c0_i32 = arith.constant 0 : i32
    %c0_i32_0 = arith.constant 0 : i32
    %c0_i32_1 = arith.constant 0 : i32
    return %c0_i32, %c0_i32_0 : i32, i32
  }
  func.func @transform_6(%arg0: i32, %arg1: i32) -> (i32, i32) {
    %c0_i32 = arith.constant 0 : i32
    %c0_i32_0 = arith.constant 0 : i32
    %c0_i32_1 = arith.constant 0 : i32
    return %c0_i32, %c0_i32_0 : i32, i32
  }
  func.func @transform_7(%arg0: i32, %arg1: i32) -> (i32, i32) {
    %c0_i32 = arith.constant 0 : i32
    %c0_i32_0 = arith.constant 0 : i32
    %c0_i32_1 = arith.constant 0 : i32
    return %c0_i32, %c0_i32_0 : i32, i32
  }
  func.func @transform_8(%arg0: i32, %arg1: i32) -> (i32, i32) {
    %c0_i32 = arith.constant 0 : i32
    %c0_i32_0 = arith.constant 0 : i32
    %c0_i32_1 = arith.constant 0 : i32
    return %c0_i32, %c0_i32_0 : i32, i32
  }
  func.func @transform_9(%arg0: i32, %arg1: i32) -> (i32, i32, i32) {
    %c0_i32 = arith.constant 0 : i32
    %c0_i32_0 = arith.constant 0 : i32
    return %arg0, %arg1, %c0_i32 : i32, i32, i32
  }
}

module attributes {stable_mosaic.version = 11 : i64} {
  func.func @_attn_kernel(%arg0: i32, %arg1: i32, %arg2: memref<1x8x32xf32, #tpu.memory_space<vmem>>, %arg3: memref<32x32xf32, #tpu.memory_space<vmem>>, %arg4: memref<32x32xf32, #tpu.memory_space<vmem>>, %arg5: memref<32x32xf32, #tpu.memory_space<vmem>>, %arg6: memref<1x32xf32, #tpu.memory_space<vmem>>, %arg7: memref<1x32xf32, #tpu.memory_space<vmem>>, %arg8: memref<1x32xf32, #tpu.memory_space<vmem>>, %arg9: memref<32x32xf32, #tpu.memory_space<vmem>>, %arg10: memref<1x32xf32, #tpu.memory_space<vmem>>, %arg11: memref<1x8x32xf32, #tpu.memory_space<vmem>>, %arg12: memref<4x8x8xf32, #tpu.memory_space<vmem>>, %arg13: memref<4x8x8xf32, #tpu.memory_space<vmem>>, %arg14: memref<4x8x8xf32, #tpu.memory_space<vmem>>, %arg15: memref<8x32xf32, #tpu.memory_space<vmem>>) attributes {dimension_semantics = [#tpu.dimension_semantics<parallel>, #tpu.dimension_semantics<arbitrary>], iteration_bounds = array<i64: 2, 1>, scalar_prefetch = 0 : i64, scratch_operands = 4 : i64, tpu.core_type = #tpu.core_type<tc>, window_params = [{transform_indices = @transform_0, window_bounds = array<i64: 1, 8, 32>}, {pipeline_mode = #tpu.pipeline_mode<synchronous>, transform_indices = @transform_1, window_bounds = array<i64: 32, 32>}, {pipeline_mode = #tpu.pipeline_mode<synchronous>, transform_indices = @transform_2, window_bounds = array<i64: 32, 32>}, {pipeline_mode = #tpu.pipeline_mode<synchronous>, transform_indices = @transform_3, window_bounds = array<i64: 32, 32>}, {pipeline_mode = #tpu.pipeline_mode<synchronous>, transform_indices = @transform_4, window_bounds = array<i64: 1, 32>}, {pipeline_mode = #tpu.pipeline_mode<synchronous>, transform_indices = @transform_5, window_bounds = array<i64: 1, 32>}, {pipeline_mode = #tpu.pipeline_mode<synchronous>, transform_indices = @transform_6, window_bounds = array<i64: 1, 32>}, {pipeline_mode = #tpu.pipeline_mode<synchronous>, transform_indices = @transform_7, window_bounds = array<i64: 32, 32>}, {pipeline_mode = #tpu.pipeline_mode<synchronous>, transform_indices = @transform_8, window_bounds = array<i64: 1, 32>}, {transform_indices = @transform_9, window_bounds = array<i64: 1, 8, 32>}]} {
    %c0_i32 = arith.constant 0 : i32
    %0 = arith.cmpi eq, %arg1, %c0_i32 : i32
    %1 = arith.extui %0 : i1 to i32
    %c0_i32_0 = arith.constant 0 : i32
    %2 = arith.cmpi ne, %1, %c0_i32_0 : i32
    scf.if %2 {
      %c0_45 = arith.constant 0 : index
      %c0_46 = arith.constant 0 : index
      %c0_47 = arith.constant 0 : index
      %64 = vector.load %arg2[%c0_45, %c0_46, %c0_47] : memref<1x8x32xf32, #tpu.memory_space<vmem>>, vector<1x8x32xf32>
      %65 = vector.shape_cast %64 : vector<1x8x32xf32> to vector<8x32xf32>
      %c0_48 = arith.constant 0 : index
      %c0_49 = arith.constant 0 : index
      %66 = vector.load %arg4[%c0_48, %c0_49] : memref<32x32xf32, #tpu.memory_space<vmem>>, vector<32x32xf32>
      %cst_50 = arith.constant dense<0.000000e+00> : vector<8x32xf32>
      %67 = tpu.matmul %65, %66, %cst_50 {dimension_numbers = #tpu.dot_dimension_numbers<[1], [0], [0], [1], [0, 0, 1, 1], [], []>} : vector<8x32xf32>, vector<32x32xf32>, vector<8x32xf32> -> vector<8x32xf32>
      %c0_51 = arith.constant 0 : index
      %c0_52 = arith.constant 0 : index
      %68 = vector.load %arg7[%c0_51, %c0_52] : memref<1x32xf32, #tpu.memory_space<vmem>>, vector<1x32xf32>
      %69 = vector.broadcast %68 : vector<1x32xf32> to vector<8x32xf32>
      %70 = arith.addf %67, %69 : vector<8x32xf32>
      %c0_53 = arith.constant 0 : index
      %c0_54 = arith.constant 0 : index
      %71 = vector.load %arg5[%c0_53, %c0_54] : memref<32x32xf32, #tpu.memory_space<vmem>>, vector<32x32xf32>
      %cst_55 = arith.constant dense<0.000000e+00> : vector<8x32xf32>
      %72 = tpu.matmul %65, %71, %cst_55 {dimension_numbers = #tpu.dot_dimension_numbers<[1], [0], [0], [1], [0, 0, 1, 1], [], []>} : vector<8x32xf32>, vector<32x32xf32>, vector<8x32xf32> -> vector<8x32xf32>
      %c0_56 = arith.constant 0 : index
      %c0_57 = arith.constant 0 : index
      %73 = vector.load %arg8[%c0_56, %c0_57] : memref<1x32xf32, #tpu.memory_space<vmem>>, vector<1x32xf32>
      %74 = vector.broadcast %73 : vector<1x32xf32> to vector<8x32xf32>
      %75 = arith.addf %72, %74 : vector<8x32xf32>
      %76 = vector.extract_strided_slice %70 {offsets = [0, 0], sizes = [8, 8], strides = [1, 1]} : vector<8x32xf32> to vector<8x8xf32>
      %c0_58 = arith.constant 0 : index
      %c0_59 = arith.constant 0 : index
      %c0_60 = arith.constant 0 : index
      %77 = vector.load %arg13[%c0_58, %c0_59, %c0_60] : memref<4x8x8xf32, #tpu.memory_space<vmem>>, vector<1x8x8xf32>
      %78 = vector.shape_cast %77 : vector<1x8x8xf32> to vector<8x8xf32>
      %79 = vector.shape_cast %76 : vector<8x8xf32> to vector<1x8x8xf32>
      tpu.vector_store %arg13[%c0_58, %c0_59, %c0_60], %79 {strides = array<i32>} : memref<4x8x8xf32, #tpu.memory_space<vmem>>, vector<1x8x8xf32>,
      %80 = vector.extract_strided_slice %75 {offsets = [0, 0], sizes = [8, 8], strides = [1, 1]} : vector<8x32xf32> to vector<8x8xf32>
      %c0_61 = arith.constant 0 : index
      %c0_62 = arith.constant 0 : index
      %c0_63 = arith.constant 0 : index
      %81 = vector.load %arg14[%c0_61, %c0_62, %c0_63] : memref<4x8x8xf32, #tpu.memory_space<vmem>>, vector<1x8x8xf32>
      %82 = vector.shape_cast %81 : vector<1x8x8xf32> to vector<8x8xf32>
      %83 = vector.shape_cast %80 : vector<8x8xf32> to vector<1x8x8xf32>
      tpu.vector_store %arg14[%c0_61, %c0_62, %c0_63], %83 {strides = array<i32>} : memref<4x8x8xf32, #tpu.memory_space<vmem>>, vector<1x8x8xf32>,
      %84 = vector.extract_strided_slice %70 {offsets = [0, 8], sizes = [8, 8], strides = [1, 1]} : vector<8x32xf32> to vector<8x8xf32>
      %c1_64 = arith.constant 1 : index
      %c0_65 = arith.constant 0 : index
      %c0_66 = arith.constant 0 : index
      %85 = vector.load %arg13[%c1_64, %c0_65, %c0_66] : memref<4x8x8xf32, #tpu.memory_space<vmem>>, vector<1x8x8xf32>
      %86 = vector.shape_cast %85 : vector<1x8x8xf32> to vector<8x8xf32>
      %87 = vector.shape_cast %84 : vector<8x8xf32> to vector<1x8x8xf32>
      tpu.vector_store %arg13[%c1_64, %c0_65, %c0_66], %87 {strides = array<i32>} : memref<4x8x8xf32, #tpu.memory_space<vmem>>, vector<1x8x8xf32>,
      %88 = vector.extract_strided_slice %75 {offsets = [0, 8], sizes = [8, 8], strides = [1, 1]} : vector<8x32xf32> to vector<8x8xf32>
      %c1_67 = arith.constant 1 : index
      %c0_68 = arith.constant 0 : index
      %c0_69 = arith.constant 0 : index
      %89 = vector.load %arg14[%c1_67, %c0_68, %c0_69] : memref<4x8x8xf32, #tpu.memory_space<vmem>>, vector<1x8x8xf32>
      %90 = vector.shape_cast %89 : vector<1x8x8xf32> to vector<8x8xf32>
      %91 = vector.shape_cast %88 : vector<8x8xf32> to vector<1x8x8xf32>
      tpu.vector_store %arg14[%c1_67, %c0_68, %c0_69], %91 {strides = array<i32>} : memref<4x8x8xf32, #tpu.memory_space<vmem>>, vector<1x8x8xf32>,
      %92 = vector.extract_strided_slice %70 {offsets = [0, 16], sizes = [8, 8], strides = [1, 1]} : vector<8x32xf32> to vector<8x8xf32>
      %c2_70 = arith.constant 2 : index
      %c0_71 = arith.constant 0 : index
      %c0_72 = arith.constant 0 : index
      %93 = vector.load %arg13[%c2_70, %c0_71, %c0_72] : memref<4x8x8xf32, #tpu.memory_space<vmem>>, vector<1x8x8xf32>
      %94 = vector.shape_cast %93 : vector<1x8x8xf32> to vector<8x8xf32>
      %95 = vector.shape_cast %92 : vector<8x8xf32> to vector<1x8x8xf32>
      tpu.vector_store %arg13[%c2_70, %c0_71, %c0_72], %95 {strides = array<i32>} : memref<4x8x8xf32, #tpu.memory_space<vmem>>, vector<1x8x8xf32>,
      %96 = vector.extract_strided_slice %75 {offsets = [0, 16], sizes = [8, 8], strides = [1, 1]} : vector<8x32xf32> to vector<8x8xf32>
      %c2_73 = arith.constant 2 : index
      %c0_74 = arith.constant 0 : index
      %c0_75 = arith.constant 0 : index
      %97 = vector.load %arg14[%c2_73, %c0_74, %c0_75] : memref<4x8x8xf32, #tpu.memory_space<vmem>>, vector<1x8x8xf32>
      %98 = vector.shape_cast %97 : vector<1x8x8xf32> to vector<8x8xf32>
      %99 = vector.shape_cast %96 : vector<8x8xf32> to vector<1x8x8xf32>
      tpu.vector_store %arg14[%c2_73, %c0_74, %c0_75], %99 {strides = array<i32>} : memref<4x8x8xf32, #tpu.memory_space<vmem>>, vector<1x8x8xf32>,
      %100 = vector.extract_strided_slice %70 {offsets = [0, 24], sizes = [8, 8], strides = [1, 1]} : vector<8x32xf32> to vector<8x8xf32>
      %c3_76 = arith.constant 3 : index
      %c0_77 = arith.constant 0 : index
      %c0_78 = arith.constant 0 : index
      %101 = vector.load %arg13[%c3_76, %c0_77, %c0_78] : memref<4x8x8xf32, #tpu.memory_space<vmem>>, vector<1x8x8xf32>
      %102 = vector.shape_cast %101 : vector<1x8x8xf32> to vector<8x8xf32>
      %103 = vector.shape_cast %100 : vector<8x8xf32> to vector<1x8x8xf32>
      tpu.vector_store %arg13[%c3_76, %c0_77, %c0_78], %103 {strides = array<i32>} : memref<4x8x8xf32, #tpu.memory_space<vmem>>, vector<1x8x8xf32>,
      %104 = vector.extract_strided_slice %75 {offsets = [0, 24], sizes = [8, 8], strides = [1, 1]} : vector<8x32xf32> to vector<8x8xf32>
      %c3_79 = arith.constant 3 : index
      %c0_80 = arith.constant 0 : index
      %c0_81 = arith.constant 0 : index
      %105 = vector.load %arg14[%c3_79, %c0_80, %c0_81] : memref<4x8x8xf32, #tpu.memory_space<vmem>>, vector<1x8x8xf32>
      %106 = vector.shape_cast %105 : vector<1x8x8xf32> to vector<8x8xf32>
      %107 = vector.shape_cast %104 : vector<8x8xf32> to vector<1x8x8xf32>
      tpu.vector_store %arg14[%c3_79, %c0_80, %c0_81], %107 {strides = array<i32>} : memref<4x8x8xf32, #tpu.memory_space<vmem>>, vector<1x8x8xf32>,
    } else {
    }
    %c0 = arith.constant 0 : index
    %c0_1 = arith.constant 0 : index
    %c0_2 = arith.constant 0 : index
    %3 = vector.load %arg2[%c0, %c0_1, %c0_2] : memref<1x8x32xf32, #tpu.memory_space<vmem>>, vector<1x8x32xf32>
    %4 = vector.shape_cast %3 : vector<1x8x32xf32> to vector<8x32xf32>
    %c0_3 = arith.constant 0 : index
    %c0_4 = arith.constant 0 : index
    %5 = vector.load %arg3[%c0_3, %c0_4] : memref<32x32xf32, #tpu.memory_space<vmem>>, vector<32x32xf32>
    %cst = arith.constant dense<0.000000e+00> : vector<8x32xf32>
    %6 = tpu.matmul %4, %5, %cst {dimension_numbers = #tpu.dot_dimension_numbers<[1], [0], [0], [1], [0, 0, 1, 1], [], []>} : vector<8x32xf32>, vector<32x32xf32>, vector<8x32xf32> -> vector<8x32xf32>
    %c0_5 = arith.constant 0 : index
    %c0_6 = arith.constant 0 : index
    %7 = vector.load %arg6[%c0_5, %c0_6] : memref<1x32xf32, #tpu.memory_space<vmem>>, vector<1x32xf32>
    %8 = vector.broadcast %7 : vector<1x32xf32> to vector<8x32xf32>
    %9 = arith.addf %6, %8 : vector<8x32xf32>
    %cst_7 = arith.constant 0.353553385 : f32
    %10 = vector.broadcast %cst_7 : f32 to vector<8x32xf32>
    %11 = arith.mulf %9, %10 : vector<8x32xf32>
    %12 = vector.extract_strided_slice %11 {offsets = [0, 0], sizes = [8, 8], strides = [1, 1]} : vector<8x32xf32> to vector<8x8xf32>
    %c0_8 = arith.constant 0 : index
    %c0_9 = arith.constant 0 : index
    %c0_10 = arith.constant 0 : index
    %13 = vector.load %arg12[%c0_8, %c0_9, %c0_10] : memref<4x8x8xf32, #tpu.memory_space<vmem>>, vector<1x8x8xf32>
    %14 = vector.shape_cast %13 : vector<1x8x8xf32> to vector<8x8xf32>
    %15 = vector.shape_cast %12 : vector<8x8xf32> to vector<1x8x8xf32>
    tpu.vector_store %arg12[%c0_8, %c0_9, %c0_10], %15 {strides = array<i32>} : memref<4x8x8xf32, #tpu.memory_space<vmem>>, vector<1x8x8xf32>,
    %16 = vector.extract_strided_slice %11 {offsets = [0, 8], sizes = [8, 8], strides = [1, 1]} : vector<8x32xf32> to vector<8x8xf32>
    %c1 = arith.constant 1 : index
    %c0_11 = arith.constant 0 : index
    %c0_12 = arith.constant 0 : index
    %17 = vector.load %arg12[%c1, %c0_11, %c0_12] : memref<4x8x8xf32, #tpu.memory_space<vmem>>, vector<1x8x8xf32>
    %18 = vector.shape_cast %17 : vector<1x8x8xf32> to vector<8x8xf32>
    %19 = vector.shape_cast %16 : vector<8x8xf32> to vector<1x8x8xf32>
    tpu.vector_store %arg12[%c1, %c0_11, %c0_12], %19 {strides = array<i32>} : memref<4x8x8xf32, #tpu.memory_space<vmem>>, vector<1x8x8xf32>,
    %20 = vector.extract_strided_slice %11 {offsets = [0, 16], sizes = [8, 8], strides = [1, 1]} : vector<8x32xf32> to vector<8x8xf32>
    %c2 = arith.constant 2 : index
    %c0_13 = arith.constant 0 : index
    %c0_14 = arith.constant 0 : index
    %21 = vector.load %arg12[%c2, %c0_13, %c0_14] : memref<4x8x8xf32, #tpu.memory_space<vmem>>, vector<1x8x8xf32>
    %22 = vector.shape_cast %21 : vector<1x8x8xf32> to vector<8x8xf32>
    %23 = vector.shape_cast %20 : vector<8x8xf32> to vector<1x8x8xf32>
    tpu.vector_store %arg12[%c2, %c0_13, %c0_14], %23 {strides = array<i32>} : memref<4x8x8xf32, #tpu.memory_space<vmem>>, vector<1x8x8xf32>,
    %24 = vector.extract_strided_slice %11 {offsets = [0, 24], sizes = [8, 8], strides = [1, 1]} : vector<8x32xf32> to vector<8x8xf32>
    %c3 = arith.constant 3 : index
    %c0_15 = arith.constant 0 : index
    %c0_16 = arith.constant 0 : index
    %25 = vector.load %arg12[%c3, %c0_15, %c0_16] : memref<4x8x8xf32, #tpu.memory_space<vmem>>, vector<1x8x8xf32>
    %26 = vector.shape_cast %25 : vector<1x8x8xf32> to vector<8x8xf32>
    %27 = vector.shape_cast %24 : vector<8x8xf32> to vector<1x8x8xf32>
    tpu.vector_store %arg12[%c3, %c0_15, %c0_16], %27 {strides = array<i32>} : memref<4x8x8xf32, #tpu.memory_space<vmem>>, vector<1x8x8xf32>,
    %c0_17 = arith.constant 0 : index
    %c0_18 = arith.constant 0 : index
    %c0_19 = arith.constant 0 : index
    %28 = vector.load %arg12[%c0_17, %c0_18, %c0_19] : memref<4x8x8xf32, #tpu.memory_space<vmem>>, vector<4x8x8xf32>
    %c0_20 = arith.constant 0 : index
    %c0_21 = arith.constant 0 : index
    %c0_22 = arith.constant 0 : index
    %29 = vector.load %arg13[%c0_20, %c0_21, %c0_22] : memref<4x8x8xf32, #tpu.memory_space<vmem>>, vector<4x8x8xf32>
    %c0_23 = arith.constant 0 : index
    %c0_24 = arith.constant 0 : index
    %c0_25 = arith.constant 0 : index
    %30 = vector.load %arg14[%c0_23, %c0_24, %c0_25] : memref<4x8x8xf32, #tpu.memory_space<vmem>>, vector<4x8x8xf32>
    "tpu.trace_start"() <{level = 10 : i32, message = "hqk,hmk->hqm"}> : () -> ()
    %cst_26 = arith.constant dense<0.000000e+00> : vector<4x8x8xf32>
    %31 = tpu.matmul %28, %29, %cst_26 {dimension_numbers = #tpu.dot_dimension_numbers<[2], [2], [1], [1], [0, 0, 0, 1, 1, 1], [0], [0]>} : vector<4x8x8xf32>, vector<4x8x8xf32>, vector<4x8x8xf32> -> vector<4x8x8xf32>
    "tpu.trace_stop"() : () -> ()
    %cst_27 = arith.constant dense<0xFF800000> : vector<4x8xf32>
    %32 = vector.multi_reduction <maximumf>, %31, %cst_27 [2] : vector<4x8x8xf32> to vector<4x8xf32>
    %33 = vector.shape_cast %32 : vector<4x8xf32> to vector<4x8x1xf32>
    %34 = vector.broadcast %33 : vector<4x8x1xf32> to vector<4x8x8xf32>
    %35 = arith.subf %31, %34 : vector<4x8x8xf32>
    %36 = math.exp %35 : vector<4x8x8xf32>
    %cst_28 = arith.constant dense<0.000000e+00> : vector<4x8xf32>
    %37 = vector.multi_reduction <add>, %36, %cst_28 [2] : vector<4x8x8xf32> to vector<4x8xf32>
    %38 = vector.shape_cast %37 : vector<4x8xf32> to vector<4x8x1xf32>
    %39 = tpu.reciprocal %38 {approx = true} : vector<4x8x1xf32> -> vector<4x8x1xf32>
    %40 = vector.broadcast %39 : vector<4x8x1xf32> to vector<4x8x8xf32>
    %41 = arith.mulf %36, %40 : vector<4x8x8xf32>
    "tpu.trace_start"() <{level = 10 : i32, message = "hqm,hmk->hqk"}> : () -> ()
    %cst_29 = arith.constant dense<0.000000e+00> : vector<4x8x8xf32>
    %42 = tpu.matmul %41, %30, %cst_29 {dimension_numbers = #tpu.dot_dimension_numbers<[2], [1], [1], [2], [0, 0, 0, 1, 1, 2], [0], [0]>} : vector<4x8x8xf32>, vector<4x8x8xf32>, vector<4x8x8xf32> -> vector<4x8x8xf32>
    "tpu.trace_stop"() : () -> ()
    %43 = vector.extract_strided_slice %42 {offsets = [0, 0, 0], sizes = [1, 8, 8], strides = [1, 1, 1]} : vector<4x8x8xf32> to vector<1x8x8xf32>
    %44 = vector.shape_cast %43 : vector<1x8x8xf32> to vector<8x8xf32>
    %c0_30 = arith.constant 0 : index
    %c0_31 = arith.constant 0 : index
    %45 = vector.load %arg15[%c0_30, %c0_31] : memref<8x32xf32, #tpu.memory_space<vmem>>, vector<8x8xf32>
    tpu.vector_store %arg15[%c0_30, %c0_31], %44 {strides = array<i32>} : memref<8x32xf32, #tpu.memory_space<vmem>>, vector<8x8xf32>,
    %46 = vector.extract_strided_slice %42 {offsets = [1, 0, 0], sizes = [1, 8, 8], strides = [1, 1, 1]} : vector<4x8x8xf32> to vector<1x8x8xf32>
    %47 = vector.shape_cast %46 : vector<1x8x8xf32> to vector<8x8xf32>
    %c0_32 = arith.constant 0 : index
    %c8 = arith.constant 8 : index
    %48 = vector.load %arg15[%c0_32, %c8] : memref<8x32xf32, #tpu.memory_space<vmem>>, vector<8x8xf32>
    tpu.vector_store %arg15[%c0_32, %c8], %47 {strides = array<i32>} : memref<8x32xf32, #tpu.memory_space<vmem>>, vector<8x8xf32>,
    %49 = vector.extract_strided_slice %42 {offsets = [2, 0, 0], sizes = [1, 8, 8], strides = [1, 1, 1]} : vector<4x8x8xf32> to vector<1x8x8xf32>
    %50 = vector.shape_cast %49 : vector<1x8x8xf32> to vector<8x8xf32>
    %c0_33 = arith.constant 0 : index
    %c16 = arith.constant 16 : index
    %51 = vector.load %arg15[%c0_33, %c16] : memref<8x32xf32, #tpu.memory_space<vmem>>, vector<8x8xf32>
    tpu.vector_store %arg15[%c0_33, %c16], %50 {strides = array<i32>} : memref<8x32xf32, #tpu.memory_space<vmem>>, vector<8x8xf32>,
    %52 = vector.extract_strided_slice %42 {offsets = [3, 0, 0], sizes = [1, 8, 8], strides = [1, 1, 1]} : vector<4x8x8xf32> to vector<1x8x8xf32>
    %53 = vector.shape_cast %52 : vector<1x8x8xf32> to vector<8x8xf32>
    %c0_34 = arith.constant 0 : index
    %c24 = arith.constant 24 : index
    %54 = vector.load %arg15[%c0_34, %c24] : memref<8x32xf32, #tpu.memory_space<vmem>>, vector<8x8xf32>
    tpu.vector_store %arg15[%c0_34, %c24], %53 {strides = array<i32>} : memref<8x32xf32, #tpu.memory_space<vmem>>, vector<8x8xf32>,
    %c0_35 = arith.constant 0 : index
    %c0_36 = arith.constant 0 : index
    %55 = vector.load %arg15[%c0_35, %c0_36] : memref<8x32xf32, #tpu.memory_space<vmem>>, vector<8x32xf32>
    %c0_37 = arith.constant 0 : index
    %c0_38 = arith.constant 0 : index
    %56 = vector.load %arg9[%c0_37, %c0_38] : memref<32x32xf32, #tpu.memory_space<vmem>>, vector<32x32xf32>
    %cst_39 = arith.constant dense<0.000000e+00> : vector<8x32xf32>
    %57 = tpu.matmul %55, %56, %cst_39 {dimension_numbers = #tpu.dot_dimension_numbers<[1], [0], [0], [1], [0, 0, 1, 1], [], []>} : vector<8x32xf32>, vector<32x32xf32>, vector<8x32xf32> -> vector<8x32xf32>
    %c0_40 = arith.constant 0 : index
    %c0_41 = arith.constant 0 : index
    %58 = vector.load %arg10[%c0_40, %c0_41] : memref<1x32xf32, #tpu.memory_space<vmem>>, vector<1x32xf32>
    %59 = vector.broadcast %58 : vector<1x32xf32> to vector<8x32xf32>
    %60 = arith.addf %57, %59 : vector<8x32xf32>
    %c0_42 = arith.constant 0 : index
    %c0_43 = arith.constant 0 : index
    %c0_44 = arith.constant 0 : index
    %61 = vector.load %arg11[%c0_42, %c0_43, %c0_44] : memref<1x8x32xf32, #tpu.memory_space<vmem>>, vector<1x8x32xf32>
    %62 = vector.shape_cast %61 : vector<1x8x32xf32> to vector<8x32xf32>
    %63 = vector.shape_cast %60 : vector<8x32xf32> to vector<1x8x32xf32>
    tpu.vector_store %arg11[%c0_42, %c0_43, %c0_44], %63 {strides = array<i32>} : memref<1x8x32xf32, #tpu.memory_space<vmem>>, vector<1x8x32xf32>,
    return
  }
  func.func @transform_0(%arg0: i32, %arg1: i32) -> (i32, i32, i32) {
    %c0_i32 = arith.constant 0 : i32
    %c0_i32_0 = arith.constant 0 : i32
    %c0_i32_1 = arith.constant 0 : i32
    return %arg0, %c0_i32, %c0_i32_0 : i32, i32, i32
  }
  func.func @transform_1(%arg0: i32, %arg1: i32) -> (i32, i32) {
    %c0_i32 = arith.constant 0 : i32
    %c0_i32_0 = arith.constant 0 : i32
    %c0_i32_1 = arith.constant 0 : i32
    return %c0_i32, %c0_i32_0 : i32, i32
  }
  func.func @transform_2(%arg0: i32, %arg1: i32) -> (i32, i32) {
    %c0_i32 = arith.constant 0 : i32
    %c0_i32_0 = arith.constant 0 : i32
    %c0_i32_1 = arith.constant 0 : i32
    return %c0_i32, %c0_i32_0 : i32, i32
  }
  func.func @transform_3(%arg0: i32, %arg1: i32) -> (i32, i32) {
    %c0_i32 = arith.constant 0 : i32
    %c0_i32_0 = arith.constant 0 : i32
    %c0_i32_1 = arith.constant 0 : i32
    return %c0_i32, %c0_i32_0 : i32, i32
  }
  func.func @transform_4(%arg0: i32, %arg1: i32) -> (i32, i32) {
    %c0_i32 = arith.constant 0 : i32
    %c0_i32_0 = arith.constant 0 : i32
    %c0_i32_1 = arith.constant 0 : i32
    return %c0_i32, %c0_i32_0 : i32, i32
  }
  func.func @transform_5(%arg0: i32, %arg1: i32) -> (i32, i32) {
    %c0_i32 = arith.constant 0 : i32
    %c0_i32_0 = arith.constant 0 : i32
    %c0_i32_1 = arith.constant 0 : i32
    return %c0_i32, %c0_i32_0 : i32, i32
  }
  func.func @transform_6(%arg0: i32, %arg1: i32) -> (i32, i32) {
    %c0_i32 = arith.constant 0 : i32
    %c0_i32_0 = arith.constant 0 : i32
    %c0_i32_1 = arith.constant 0 : i32
    return %c0_i32, %c0_i32_0 : i32, i32
  }
  func.func @transform_7(%arg0: i32, %arg1: i32) -> (i32, i32) {
    %c0_i32 = arith.constant 0 : i32
    %c0_i32_0 = arith.constant 0 : i32
    %c0_i32_1 = arith.constant 0 : i32
    return %c0_i32, %c0_i32_0 : i32, i32
  }
  func.func @transform_8(%arg0: i32, %arg1: i32) -> (i32, i32) {
    %c0_i32 = arith.constant 0 : i32
    %c0_i32_0 = arith.constant 0 : i32
    %c0_i32_1 = arith.constant 0 : i32
    return %c0_i32, %c0_i32_0 : i32, i32
  }
  func.func @transform_9(%arg0: i32, %arg1: i32) -> (i32, i32, i32) {
    %c0_i32 = arith.constant 0 : i32
    %c0_i32_0 = arith.constant 0 : i32
    return %arg0, %arg1, %c0_i32 : i32, i32, i32
  }
}

</mosaic_0001>

<bundles_post_ra>
// kernel: tpu_custom_call.1
= control target key start
LH: loop header
LB: loop body
LE: loop exit
PB: predicated region body
PF: predicated region fallthrough
CT: control target
= control target key end

     0   :  { %s2652_s0 = inlined_call_operand.hbm [shape: f32[2,8,32], index: 0, kind: input, shape index: {}]   ;;  %s2653_s1 = inlined_call_operand.hbm [shape: f32[32,32], index: 1, kind: input, shape index: {}]   ;;  %s2654_s2 = inlined_call_operand.hbm [shape: f32[32,32], index: 2, kind: input, shape index: {}]   ;;  %s2655_s3 = inlined_call_operand.hbm [shape: f32[32,32], index: 3, kind: input, shape index: {}]   ;;  %s2656_s4 = inlined_call_operand.vmem [shape: f32[1,32], index: 4, kind: input, shape index: {}]   ;;  %s2657_s5 = inlined_call_operand.vmem [shape: f32[1,32], index: 5, kind: input, shape index: {}]   ;;  %s2658_s6 = inlined_call_operand.vmem [shape: f32[1,32], index: 6, kind: input, shape index: {}]   ;;  %s2659_s7 = inlined_call_operand.hbm [shape: f32[32,32], index: 7, kind: input, shape index: {}]   ;;  %s2660_s8 = inlined_call_operand.vmem [shape: f32[1,32], index: 8, kind: input, shape index: {}]   ;;  %s2661_s9 = inlined_call_operand.hbm [shape: f32[2,8,32], index: 9, kind: output, shape index: {}]  }
   0x1   :  { %2668 = sst [smem:[#allocation21_spill]] %s2653_s1 }
   0x2   :  { %2669 = sst [smem:[#allocation22_spill]] %s2660_s8 }
   0x3   :  { %2670 = sst [smem:[#allocation23_spill]] %s2661_s9 }
   0x4   :  { %14 = vsyncpa [#allocation7], 0 }
   0x5   :  { %16 = vsyncpa [#allocation7 + $0x1], 0 }
   0x6   :  { %17 = vsyncpa [#allocation10], 0 }
   0x7   :  { %18 = vsyncpa [#allocation13], 0 }
   0x8   :  { %19 = vsyncpa [#allocation8], 0 }
   0x9   :  { %21 = vsyncpa [#allocation8 + $0x1], 0  ;;  %s2236_s30 = smov 0   ;;  %s2238_s10 = smov 0  }
   0xa   :  { %s2240_s11 = smov 0   ;;  %s2242_s12 = smov 0  }
   0xb   :  { %s2244_s13 = smov 0   ;;  %s2246_s14 = smov 0  }
   0xc LB: > { %2671 = sst [smem:[#allocation20_spill]] %s2159_s12  ;;  %s2662_s15 = sadd.s32 4294967295, %s2167_s14   ;;  %s2167_s14 = sphi %s2246_s14, %s27_s14   ;;  %s2163_s13 = sphi %s2244_s13, %s2696_s13   ;;  %s2159_s12 = sphi %s2242_s12, %s2695_s12   ;;  %s2155_s11 = sphi %s2240_s11, %s2694_s11   ;;  %s2151_s10 = sphi %s2238_s10, %s2693_s10   ;;  %s2147_s30 = sphi %s2236_s30, %s2692_s30  }
   0xd   : > { %p1622_p0 = scmp.ge.s32.totalorder %s2167_s14, 1  ;;  %p2270_p1 = scmp.eq.s32.totalorder %s2662_s15, 0 }
   0xe   : > { %p266_p2 = scmp.lt.s32.totalorder %s2167_s14, 3  ;;  %s2169_s18 = smov [#allocation9]  }
   0xf   : > { %s2672_s16 = scalar_select %p2270_p1, 1, 0 }
  0x10   : > { %p2275_p3 = pnand %p1622_p0, %p266_p2  ;;  %s278_s19 = sshll.u32 %s2169_s18, 4  ;;  %s2279_s19 = int_to_ptr.vmem [resolvable:$true] %s278_s19 }
  0x11   : > { %s2170_s21 = smov [#allocation12]   ;;  %s2171_s23 = smov [#allocation11]  }
  0x12   : > { %s2673_s17 = scalar_select %p2275_p3, 1, 0 }
  0x13   : > { %p1825_p4 = pneg %p2275_p3  ;;  %s304_s22 = sshll.u32 %s2170_s21, 4  ;;  %s2290_s22 = int_to_ptr.vmem [resolvable:$true] %s304_s22 }
  0x14   : > { %s2292_s24 = sshll.u32 %s2171_s23, 4  ;;  %s2675_s1 = sld [smem:[#allocation21_spill]]  ;;  %s292_s24 = int_to_ptr.vmem [resolvable:$true] %s2292_s24 }
  0x15   : > { %p2286_p6 = pnand %p1825_p4, %p2270_p1 }
  0x17   : > { %p2302_p8 = pneg %p2286_p6 }
  0x1a   : > { %s1935_s27 = scalar_lea.hbm %s2675_s1, 512 }
  0x1b   : > { %p1936_p7 = scmp.ne.s32.totalorder %s2675_s1, %s1935_s27  ;;  %p1942_p11 = scmp.lt.u32.totalorder %s1935_s27, %s2675_s1 }
  0x1d   : > { %p1938_p9 = pnand %p2302_p8, %p1936_p7 }
  0x1f   : > { %p1939_p10 = pneg %p1938_p9 }
  0x21   : > { %p1944_p12 = pnand %p1942_p11, %p1939_p10 }
  0x23   : > { %1947 = shalt.err (!%p1944_p12)
}
  0x24   : > { %s1948_s25 = scalar_lea.vmem %s2279_s19, 512  ;;  %p1956_p4 = scmp.lt.s32.totalorder %s2279_s19, %s2279_s19 }
  0x25   : > { %p1949_p13 = scmp.ne.s32.totalorder %s2279_s19, %s1948_s25  ;;  %p1957_p5 = scmp.lt.s32.totalorder %s1948_s25, %s1948_s25 }
  0x27   : > { %p1951_p0 = pnand %p1949_p13, %p2302_p8  ;;  %p1958_p7 = por %p1957_p5, %p1956_p4 }
  0x29   : > { %p1952_p2 = pneg %p1951_p0 }
  0x2b   : > { %p1959_p9 = pnand %p1958_p7, %p1952_p2 }
  0x2d   : > { %1962 = shalt.err (!%p1959_p9)
}
  0x2e   : > { %s2172_s26 = smov 128   ;;  %s2173_s27 = smov 8  }
  0x2f   : > { %1828 = dma.hbm_to_vmem [thread:$0]  (!%p2286_p6), %s2675_s1, 512, %s2279_s19, [#allocation10], %s2172_s26, %s2172_s26, %s2173_s27  }
  0x30   : > { %s1963_s25 = scalar_lea.hbm %s2655_s3, 512 }
  0x31   : > { %p1964_p5 = scmp.ne.s32.totalorder %s2655_s3, %s1963_s25  ;;  %p1970_p12 = scmp.lt.u32.totalorder %s1963_s25, %s2655_s3 }
  0x33   : > { %p1966_p10 = pnand %p1964_p5, %p2302_p8 }
  0x35   : > { %p1967_p11 = pneg %p1966_p10 }
  0x37   : > { %p1972_p13 = pnand %p1970_p12, %p1967_p11 }
  0x39   : > { %1975 = shalt.err (!%p1972_p13)
}
  0x3a   : > { %s1976_s19 = scalar_lea.vmem %s2290_s22, 512  ;;  %p1984_p7 = scmp.lt.s32.totalorder %s2290_s22, %s2290_s22 }
  0x3b   : > { %p1977_p0 = scmp.ne.s32.totalorder %s2290_s22, %s1976_s19  ;;  %p1985_p9 = scmp.lt.s32.totalorder %s1976_s19, %s1976_s19 }
  0x3d   : > { %p1979_p2 = pnand %p1977_p0, %p2302_p8  ;;  %p1986_p5 = por %p1985_p9, %p1984_p7 }
  0x3f   : > { %p1980_p4 = pneg %p1979_p2 }
  0x41   : > { %p1987_p10 = pnand %p1986_p5, %p1980_p4 }
  0x43   : > { %1990 = shalt.err (!%p1987_p10)
}
  0x44   : > { %1834 = dma.hbm_to_vmem [thread:$0]  (!%p2286_p6), %s2655_s3, 512, %s2290_s22, [#allocation13], %s2172_s26, %s2172_s26, %s2173_s27  }
  0x45   : > { %s1991_s28 = scalar_lea.hbm %s2654_s2, 512 }
  0x46   : > { %p1992_p11 = scmp.ne.s32.totalorder %s2654_s2, %s1991_s28  ;;  %p1998_p0 = scmp.lt.u32.totalorder %s1991_s28, %s2654_s2 }
  0x48   : > { %p1994_p12 = pnand %p1992_p11, %p2302_p8 }
  0x4a   : > { %p1995_p13 = pneg %p1994_p12 }
  0x4c   : > { %p2000_p2 = pnand %p1998_p0, %p1995_p13 }
  0x4e   : > { %2003 = shalt.err (!%p2000_p2)
}
  0x4f   : > { %s2004_s19 = scalar_lea.vmem %s292_s24, 512  ;;  %p2012_p5 = scmp.lt.s32.totalorder %s292_s24, %s292_s24 }
  0x50   : > { %p2005_p4 = scmp.ne.s32.totalorder %s292_s24, %s2004_s19  ;;  %p2013_p10 = scmp.lt.s32.totalorder %s2004_s19, %s2004_s19 }
  0x52   : > { %p2007_p7 = pnand %p2005_p4, %p2302_p8  ;;  %p2014_p3 = por %p2013_p10, %p2012_p5 }
  0x54   : > { %p2008_p9 = pneg %p2007_p7 }
  0x56   : > { %p2015_p1 = pnand %p2014_p3, %p2008_p9 }
  0x58   : > { %2018 = shalt.err (!%p2015_p1)
}
  0x59   : > { %1831 = dma.hbm_to_vmem [thread:$0]  (!%p2286_p6), %s2654_s2, 512, %s292_s24, [#allocation10], %s2172_s26, %s2172_s26, %s2173_s27  }
  0x5a   : > { %s2174_s9 = smov [#allocation14]   ;;  %s2019_s29 = scalar_lea.hbm %s2659_s7, 512 }
  0x5b   : > { %s326_s12 = sshll.u32 %s2174_s9, 4  ;;  %p2020_p1 = scmp.ne.s32.totalorder %s2659_s7, %s2019_s29  ;;  %s327_s12 = int_to_ptr.vmem [resolvable:$true] %s326_s12 }
  0x5c   : > { %p2026_p12 = scmp.lt.u32.totalorder %s2019_s29, %s2659_s7 }
  0x5d   : > { %p2022_p3 = pnand %p2020_p1, %p2302_p8 }
  0x5f   : > { %p2023_p11 = pneg %p2022_p3 }
  0x61   : > { %p2028_p13 = pnand %p2026_p12, %p2023_p11 }
  0x63   : > { %2031 = shalt.err (!%p2028_p13)
}
  0x64   : > { %s2032_s24 = scalar_lea.vmem %s327_s12, 512  ;;  %p2040_p7 = scmp.lt.s32.totalorder %s327_s12, %s327_s12 }
  0x65   : > { %p2033_p0 = scmp.ne.s32.totalorder %s327_s12, %s2032_s24  ;;  %p2041_p9 = scmp.lt.s32.totalorder %s2032_s24, %s2032_s24 }
  0x67   : > { %p2035_p2 = pnand %p2033_p0, %p2302_p8  ;;  %p2042_p5 = por %p2041_p9, %p2040_p7 }
  0x69   : > { %p2036_p4 = pneg %p2035_p2 }
  0x6b   : > { %p2043_p10 = pnand %p2042_p5, %p2036_p4 }
  0x6d   : > { %2046 = shalt.err (!%p2043_p10)
}
  0x6e   : > { %1837 = dma.hbm_to_vmem [thread:$0]  (!%p2286_p6), %s2659_s7, 512, %s327_s12, [#allocation13], %s2172_s26, %s2172_s26, %s2173_s27  }
  0x6f   : > { %s1621_s20 = sadd.s32 4294967294, %s2167_s14   ;;  %s39_s18 = sadd.s32 1, %s2163_s13 }
  0x70   : > { %p41_p8 = scmp.ge.s32.totalorder %s39_s18, 2  ;;  %s46_s9 = sadd.s32 1, %s2155_s11 }
  0x71   : > { %p53_p1 = scmp.ne.s32.totalorder %s2155_s11, %s2151_s10  ;;  %p54_p3 = scmp.eq.s32.totalorder %s2167_s14, 0 }
  0x72   : > { %s2698_s18 = smov (%p41_p8, %s39_s18), 0  ;;  %p59_p12 = scmp.ne.s32.totalorder %s2151_s10, %s2147_s30 }
  0x73   : > { %p2403_p11 = por %p54_p3, %p53_p1  ;;  %s43_s26 = ssub.s32 %s2163_s13, %s2698_s18 }
  0x74   : > { %s2678_s27 = sadd.s32 4294967295, %s2167_s14   ;;  %p44_p13 = scmp.eq.s32.totalorder %s43_s26, 0 }
  0x75   : > { %p253_p6 = scmp.eq.s32.totalorder %s2678_s27, 1  ;;  %p2679_p0 = scmp.ne.s32.totalorder %s2672_s16, 0 }
  0x76   : > { %p259_p7 = scmp.eq.s32.totalorder %s1621_s20, 1  ;;  %p1850_p5 = scmp.lt.s32.totalorder %s2167_s14, 2 }
  0x77   : > { %p2415_p2 = por %p2679_p0, %p59_p12  ;;  %p2419_p4 = por %p253_p6, %p53_p1 }
  0x78   : > { %s2424_s29 = scalar_select %p44_p13, %s2155_s11, %s46_s9  }
  0x79   : > { %s2681_s28 = scalar_select %p2419_p4, 1, 0 }
  0x7a   : > { %p2426_p9 = por %p259_p7, %p59_p12  ;;  %s343_s23 = sand.u32 1, %s2155_s11  }
  0x7b   : > { %s1629_s25 = sshll.u32 %s2163_s13, 7  ;;  %s1628_s19 = sshll.u32 %s343_s23, 3 }
  0x7c   : > { %s2682_s21 = scalar_select %p2426_p9, 1, 0 }
  0x7d   : > { %s2436_s8 = scalar_lea.hbm %s2652_s0, %s1629_s25  ;;  %s347_s20 = scalar_lea.vmem [#allocation6], %s1628_s19 }
  0x7e   : > { %s354_s9 = sshll.u32 %s347_s20, 4  ;;  %p2440_p10 = pnand %p1850_p5, %p2403_p11  ;;  %s2444_s9 = int_to_ptr.vmem [resolvable:$true] %s354_s9 }
  0x7f   : > { %s344_s27 = scalar_lea.sflag [#allocation7], %s343_s23  ;;  %s2047_s1 = scalar_lea.hbm %s2436_s8, 128 }
  0x80   : > { %p2048_p8 = scmp.ne.s32.totalorder %s2436_s8, %s2047_s1  ;;  %p2049_p1 = pneg %p2440_p10 }
  0x81   : > { %s2052_s15 = scalar_lea.hbm %s2652_s0, 256  ;;  %p2053_p11 = scmp.lt.u32.totalorder %s2436_s8, %s2652_s0 }
  0x82   : > { %p2050_p3 = pnand %p2049_p1, %p2048_p8  ;;  %p2054_p6 = scmp.lt.u32.totalorder %s2052_s15, %s2047_s1 }
  0x83   : > { %p2056_p0 = scmp.lt.u32.totalorder %s2047_s1, %s2436_s8 }
  0x84   : > { %p2051_p12 = pneg %p2050_p3  ;;  %p2055_p13 = por %p2054_p6, %p2053_p11 }
  0x86   : > { %p2057_p7 = por %p2056_p0, %p2055_p13 }
  0x88   : > { %p2058_p5 = pnand %p2057_p7, %p2051_p12 }
  0x8a   : > { %2061 = shalt.err (!%p2058_p5)
}
  0x8b   : > { %s2062_s23 = scalar_lea.vmem %s2444_s9, 128  ;;  %s2175_s20 = smov [#allocation6]  }
  0x8c   : > { %p2063_p8 = scmp.ne.s32.totalorder %s2444_s9, %s2062_s23  ;;  %s2067_s25 = sshll.u32 %s2175_s20, 4  ;;  %s2068_s25 = int_to_ptr.vmem [resolvable:$false] %s2067_s25 }
  0x8d   : > { %s2069_s19 = scalar_lea.vmem %s2068_s25, 256  ;;  %p2070_p4 = scmp.lt.s32.totalorder %s2444_s9, %s2068_s25 }
  0x8e   : > { %p2065_p3 = pnand %p2063_p8, %p2049_p1  ;;  %p2071_p11 = scmp.lt.s32.totalorder %s2069_s19, %s2062_s23 }
  0x90   : > { %p2066_p9 = pneg %p2065_p3  ;;  %p2072_p6 = por %p2071_p11, %p2070_p4 }
  0x92   : > { %p2073_p13 = pnand %p2072_p6, %p2066_p9 }
  0x94   : > { %2076 = shalt.err (!%p2073_p13)
}
  0x95   : > { %1841 = dma.hbm_to_vmem [thread:$0]  (!%p2440_p10), %s2436_s8, 128, %s2444_s9, %s344_s27  }
  0x96   : > { %p2684_p12 = scmp.ne.s32.totalorder %s2673_s17, 0 }
  0x97   : > { %s2474_s1 = sand.u32 (!%p2684_p12), 1, %s2151_s10  }
  0x98   : > { %363 = sbr.rel (%p2684_p12) target bundleno = 1621 (0x655), region = 56  ;;  %s1631_s15 = sshll.u32 (!%p2684_p12), %s2474_s1, 3 }
  0x99   : > { %s366_s24 = scalar_lea.sflag (!%p2684_p12), [#allocation7], %s2474_s1  ;;  %s369_s22 = scalar_lea.vmem (!%p2684_p12), [#allocation6], %s1631_s15 }
  0x9f   : > { %2130 = dma.done.wait (%p2415_p2), %s366_s24, 128  }
  0xa0   : > { %2132 = vsyncadd (%p2415_p2), %s366_s24, 4294967168  ;;  %p2685_p4 = scmp.ne.s32.totalorder %s2672_s16, 0 }
  0xa2   : > { %2134 = dma.done.wait (%p2685_p4), [#allocation10], 1024  }
  0xa3   : > { %2136 = vsyncadd (%p2685_p4), [#allocation10], 4294966272 }
  0xa4   : > { %2138 = dma.done.wait (%p2685_p4), [#allocation13], 1024  }
  0xa5   : > { %2140 = vsyncadd (%p2685_p4), [#allocation13], 4294966272  ;;  %v2176_v0 = vmov 0.0|0.0   ;;  %vm2177_vm0 = vmmov 0   ;;  %v2178_v1 = vmov 0.0   ;;  %v425_v2 = vld [vmem:[#allocation11] sm:$0xff] }
  0xa6   : > { %1781 = vmatprep.subr.bf16.mxu0 %v2176_v0  ;;  %1705 = vmatprep.mubr.msk.f32.mxu0 %vm2177_vm0, %v2178_v1  ;;  %v426_v3 = vld [vmem:[#allocation11 + $0x8] sm:$0xff]  ;;  %v427_v4 = vld [vmem:[#allocation11 + $0x10] sm:$0xff]  ;;  %v428_v6 = vld [vmem:[#allocation11 + $0x18] sm:$0xff]  ;;  %vm436_vm1 = vcmask 261120   ;;  %vm591_vm2 = vcmask 64512   ;;  %s2179_s12 = smov 112  }
  0xa7   : > { %1787 = vmatprep.subr.bf16.mxu1 %v2176_v0  ;;  %1716 = vmatprep.mubr.msk.f32.mxu1 %vm2177_vm0, %v2178_v1  ;;  %v1782_v5 = vpack.c.bf16 %v426_v3, %v425_v2  ;;  %v1785_v7 = vpack.c.bf16 %v428_v6, %v427_v4  ;;  %v510_v8 = vld [vmem:[#allocation12] sm:$0xff]  ;;  %v511_v9 = vld [vmem:[#allocation12 + $0x8] sm:$0xff]  ;;  %v424_v13 = vld [vmem:[%s369_s22] sm:$0xff]  ;;  %s2180_s8 = smov 120   ;;  %s2181_s27 = smov 104   ;;  %vm1388_vm3 = vcmask 130112  }
  0xa8   : > { %v627_v10 = vld [vmem:[#allocation9] sm:$0xff]  ;;  %v628_v11 = vld [vmem:[#allocation9 + $0x8] sm:$0xff]  ;;  %v1788_v12 = vpack.c.bf16 %v511_v9, %v510_v8  ;;  %v629_v15 = vld [vmem:[#allocation9 + $0x10] sm:$0xff]  ;;  %s2182_s25 = smov 8   ;;  %s2183_s19 = smov 24   ;;  %vm1394_vm4 = vcmask 195712  }
  0xa9   : > { %1783 = vmatpush3.bf16.msra.mxu0 %v1782_v5  ;;  %v1794_v14 = vpack.c.bf16 %v628_v11, %v627_v10  ;;  %v630_v16 = vld [vmem:[#allocation9 + $0x18] sm:$0xff]  ;;  %v512_v18 = vld [vmem:[#allocation12 + $0x10] sm:$0xff]  ;;  %v1637_v21 = vld [vmem:[%s2657_s5] ss:$0 sm:$0xff]  ;;  %s2686_s24 = sld [smem:[#allocation20_spill]]  ;;  %s2184_s22 = smov 16  }
  0xaa   : > { %1784 = vmatprep.subr.bf16.mxu0 %v2176_v0  ;;  %1789 = vmatpush3.bf16.msra.mxu1 %v1788_v12  ;;  %v1797_v17 = vpack.c.bf16 %v630_v16, %v629_v15  ;;  %v513_v19 = vld [vmem:[#allocation12 + $0x18] sm:$0xff]  ;;  %v1641_v25 = vld [vmem:[%s2656_s4] ss:$0 sm:$0xff]  ;;  %vm1400_vm5 = vcmask 261312   ;;  %s419_s9 = scalar_lea.vmem [#allocation15], %s1631_s15  ;;  %s2688_s20 = sld [smem:[#allocation23_spill]] }
  0xab   : > { %1790 = vmatprep.subr.bf16.mxu1 %v2176_v0  ;;  %v1791_v20 = vpack.c.bf16 %v513_v19, %v512_v18  ;;  %v1639_v32 = vld [vmem:[%s2658_s6] ss:$0 sm:$0xff]  ;;  %s1503_s26 = sshll.u32 %s419_s9, 4  ;;  %p2689_p9 = scmp.ne.s32.totalorder %s2681_s28, 0  ;;  %s2604_s26 = int_to_ptr.vmem [resolvable:$true] %s1503_s26 }
  0xac   : > { %s2185_s15 = smov [#allocation15]  }
  0xad   : > { %1786 = vmatpush3.bf16.msra.mxu0 %v1785_v7 }
  0xae   : > { %1793 = vmatprep.subr.bf16.mxu0 %v2176_v0  ;;  %1792 = vmatpush3.bf16.msra.mxu1 %v1791_v20 }
  0xaf   : > { %1730 = vmatprep.subr.mxu1 %v2178_v1 }
  0xb0   : > { %1706 = vmatmul.mubr.msk.f32.vlgmr.msra.gmra.mrb[0].mxu0 %vm436_vm1, %v424_v13 }
  0xb1   : > { %1795 = vmatpush3.bf16.msra.mxu0 %v1794_v14  ;;  %1727 = vmatprep.mubr.msk.f32.mxu0 %vm2177_vm0, %v2178_v1 }
  0xb2   : > { %1796 = vmatprep.subr.bf16.mxu0 %v2176_v0  ;;  %1717 = vmatmul.mubr.msk.f32.vlgmr.msra.gmra.mrb[0].mxu1 %vm436_vm1, %v424_v13 }
  0xb3   : > { %1732 = vmatprep.mubr.msk.f32.mxu1 %vm2177_vm0, %v2178_v1 }
  0xb5   : > { %1798 = vmatpush3.bf16.msra.mxu0 %v1797_v17 }
  0xb6   : > { %1750 = vmatprep.subr.mxu0 %v2178_v1 }
  0xb8   : > { %1728 = vmatmul.mubr.msk.f32.vlgmr.msra.gmra.mrb[2].mxu0 %vm436_vm1, %v424_v13 }
  0xb9   : > { %1752 = vmatprep.mubr.msk.f32.mxu0 %vm2177_vm0, %v2178_v1 }
 0x183   : > { %v506_v22 = vpop.f32.mrb[0].mxu0 }
 0x184   : > { %v507_v23 = vadd.f32 %v1637_v21, %v506_v22  ;;  %v1707_v24 = vpop.f32.mrb[1].mxu0 }
 0x185   : > { %v587_v33 = vpop.f32.mrb[0].mxu1 }
 0x186   : > { %592 = vst.msk [vmem:[#allocation3] sm:$0xff] %vm591_vm2, %v507_v23  ;;  %606 = vrot.lane.b32.xlu1 %v507_v23, %s2179_s12  ;;  %595 = vrot.lane.b32.xlu0 %v507_v23, %s2180_s8  ;;  %v2535_v34 = vadd.f32 %v1639_v32, %v587_v33  ;;  %v1718_v35 = vpop.f32.mrb[1].mxu1 }
 0x188   : > { %593 = vst.msk [vmem:[#allocation4] sm:$0xff] %vm591_vm2, %v2535_v34 }
 0x18b   : > { %v708_v26 = vpop.f32.mrb[2].mxu0 }
 0x18c   : > { %v709_v27 = vadd.f32 %v1641_v25, %v708_v26  ;;  %v1729_v28 = vpop.f32.mrb[3].mxu0 }
 0x18d   : > { %v735_v29 = vld [vmem:[#allocation3] sm:$0xff] }
 0x18e   : > { %v712_v30 = vmul.f32 0.35355338, %v709_v27  ;;  %1731 = vmatpush3.xpose.msk.msra.mxu1 %vm591_vm2, %v735_v29 }
 0x18f   : > { %1735 = vmatprep.subr.mxu1 %v2178_v1  ;;  %v739_v48 = vld [vmem:[#allocation4] sm:$0xff] }
 0x190   : > { %714 = vst.msk [vmem:[#allocation2] sm:$0xff] %vm591_vm2, %v712_v30  ;;  %721 = vrot.lane.b32.xlu1 %v712_v30, %s2179_s12  ;;  %716 = vrot.lane.b32.xlu0 %v712_v30, %s2180_s8 }
 0x191   : > { %1751 = vmatpush3.msra.mxu0 %v739_v48 }
 0x192   : > { %1760 = vmatprep.subr.mxu0 %v2178_v1 }
 0x194   : > { %726 = vrot.lane.b32.xlu1 %v712_v30, %s2181_s27  ;;  %616 = vrot.lane.b32.xlu0 %v507_v23, %s2181_s27 }
 0x197   : > { %v731_v31 = vld [vmem:[#allocation2] sm:$0xff] }
 0x198   : > { %1733 = vmatmul.mubr.msk.f32.vlgmr.msra.gmra.mrb[2].mxu1 %vm591_vm2, %v731_v31 }
 0x199   : > { %1737 = vmatprep.mubr.msk.f32.mxu1 %vm2177_vm0, %v2178_v1 }
 0x1f8   : > { %v607_v36 = vpop.permute.xlu1 %606  ;;  %v596_v37 = vpop.permute.xlu0 %595 }
 0x1f9   : > { %610 = vst.msk [vmem:[#allocation3 + $0x10] sm:$0xff] %vm591_vm2, %v607_v36  ;;  %599 = vst.msk [vmem:[#allocation3 + $0x8] sm:$0xff] %vm591_vm2, %v596_v37 }
 0x200   : > { %v736_v38 = vld [vmem:[#allocation3 + $0x8] sm:$0xff]  ;;  %v737_v44 = vld [vmem:[#allocation3 + $0x10] sm:$0xff] }
 0x201   : > { %1736 = vmatpush3.xpose.msk.msra.mxu1 %vm591_vm2, %v736_v38 }
 0x202   : > { %v722_v39 = vpop.permute.xlu1 %721  ;;  %v717_v40 = vpop.permute.xlu0 %716  ;;  %1740 = vmatprep.subr.mxu1 %v2178_v1 }
 0x203   : > { %725 = vst.msk [vmem:[#allocation2 + $0x10] sm:$0xff] %vm591_vm2, %v722_v39  ;;  %720 = vst.msk [vmem:[#allocation2 + $0x8] sm:$0xff] %vm591_vm2, %v717_v40  ;;  %v1403_v39 = vld [vmem:[#allocation14] sm:$0xff]  ;;  %v1404_v40 = vld [vmem:[#allocation14 + $0x8] sm:$0xff] }
 0x206   : > { %v727_v41 = vpop.permute.xlu1 %726  ;;  %v617_v42 = vpop.permute.xlu0 %616 }
 0x207   : > { %730 = vst.msk [vmem:[#allocation2 + $0x18] sm:$0xff] %vm591_vm2, %v727_v41  ;;  %620 = vst.msk [vmem:[#allocation3 + $0x18] sm:$0xff] %vm591_vm2, %v617_v42  ;;  %v1800_v41 = vpack.c.bf16 %v1404_v40, %v1403_v39  ;;  %v1405_v42 = vld [vmem:[#allocation14 + $0x10] sm:$0xff] }
 0x20a   : > { %v732_v43 = vld [vmem:[#allocation2 + $0x8] sm:$0xff]  ;;  %v733_v45 = vld [vmem:[#allocation2 + $0x10] sm:$0xff] }
 0x20b   : > { %1738 = vmatmul.mubr.msk.f32.vlgmr.msra.gmra.mrb[4].mxu1 %vm591_vm2, %v732_v43  ;;  %v1406_v43 = vld [vmem:[#allocation14 + $0x18] sm:$0xff] }
 0x20c   : > { %1741 = vmatpush3.xpose.msk.msra.mxu1 %vm591_vm2, %v737_v44  ;;  %1742 = vmatprep.mubr.msk.f32.mxu1 %vm2177_vm0, %v2178_v1  ;;  %v1803_v44 = vpack.c.bf16 %v1406_v43, %v1405_v42 }
 0x20d   : > { %1745 = vmatprep.subr.mxu1 %v2178_v1 }
 0x20e   : > { %v738_v46 = vld [vmem:[#allocation3 + $0x18] sm:$0xff] }
 0x20f   : > { %1743 = vmatmul.mubr.msk.f32.vlgmr.msra.gmra.mrb[6].mxu1 %vm591_vm2, %v733_v45  ;;  %v734_v47 = vld [vmem:[#allocation2 + $0x18] sm:$0xff] }
 0x210   : > { %1746 = vmatpush3.xpose.msk.msra.mxu1 %vm591_vm2, %v738_v46  ;;  %1747 = vmatprep.mubr.msk.f32.mxu1 %vm2177_vm0, %v2178_v1 }
 0x211   : > { %1755 = vmatprep.subr.mxu1 %v2178_v1 }
 0x213   : > { %1748 = vmatmul.mubr.msk.f32.vlgmr.msra.gmra.mrb[8].mxu1 %vm591_vm2, %v734_v47 }
 0x214   : > { %1757 = vmatprep.mubr.msk.f32.mxu1 %vm2177_vm0, %v2178_v1 }
 0x26b   : > { %v815_v49 = vpop.f32.mrb[2].mxu1 }
 0x26c   : > { %v1734_v50 = vpop.f32.mrb[3].mxu1  ;;  %v1047_v51 = vsel %vm591_vm2, %v815_v49, -inf }
 0x26d   : > { %1048 = vmax.xlane.f32.xlu0 %v1047_v51 }
 0x2de   : > { %v891_v52 = vpop.f32.mrb[4].mxu1 }
 0x2df   : > { %v1739_v53 = vpop.f32.mrb[5].mxu1  ;;  %v1050_v54 = vsel %vm591_vm2, %v891_v52, -inf }
 0x2e0   : > { %1051 = vmax.xlane.f32.xlu1 %v1050_v54 }
 0x2e2   : > { %v967_v55 = vpop.f32.mrb[6].mxu1 }
 0x2e3   : > { %v1744_v56 = vpop.f32.mrb[7].mxu1  ;;  %v1053_v57 = vsel %vm591_vm2, %v967_v55, -inf }
 0x2e4   : > { %1054 = vmax.xlane.f32.xlu0 %v1053_v57 }
 0x2e6   : > { %v1043_v58 = vpop.f32.mrb[8].mxu1 }
 0x2e7   : > { %v1749_v59 = vpop.f32.mrb[9].mxu1  ;;  %v1056_v60 = vsel %vm591_vm2, %v1043_v58, -inf }
 0x2e8   : > { %1057 = vmax.xlane.f32.xlu0 %v1056_v60 }
 0x2f1   : > { %601 = vrot.lane.b32.xlu1 %v2535_v34, %s2180_s8  ;;  %s1658_s8 = sshll.u32 %s2686_s24, 7  ;;  %s2077_s24 = scalar_lea.vmem %s2604_s26, 128 }
 0x2f2   : > { %p2078_p2 = scmp.ne.s32.totalorder %s2604_s26, %s2077_s24 }
 0x2f4   : > { %p2079_p10 = pnand %p2078_p2, %p2689_p9 }
 0x2f6   : > { %p2080_p1 = pneg %p2079_p10 }
 0x2fa   : > { %v1049_v61 = vpop.xlane.xlu0 %1048 }
 0x2fb   : > { %v1059_v62 = vsub.f32 %v815_v49, %v1049_v61 }
 0x2fd   : > { %v1063_v63 = vmul.f32 1.442695, %v1059_v62 }
 0x2ff   : > { %1919 = vpow2.f32 %v1063_v63 }
 0x309   : > { %v1920_v2 = vpop.eup %1919 }
 0x30a   : > { %v1071_v3 = vsel %vm591_vm2, %v1920_v2, 0.0 }
 0x315   : > { %1072 = vadd.xlane.f32.xlu1 %v1071_v3 }
 0x36d   : > { %v1052_v4 = vpop.xlane.xlu1 %1051 }
 0x36e   : > { %v1060_v5 = vsub.f32 %v891_v52, %v1052_v4 }
 0x370   : > { %v1065_v6 = vmul.f32 1.442695, %v1060_v5 }
 0x371   : > { %v602_v7 = vpop.permute.xlu1 %601  ;;  %v1055_v8 = vpop.xlane.xlu0 %1054 }
 0x372   : > { %1921 = vpow2.f32 %v1065_v6  ;;  %605 = vst.msk [vmem:[#allocation4 + $0x8] sm:$0xff] %vm591_vm2, %v602_v7  ;;  %v1061_v9 = vsub.f32 %v967_v55, %v1055_v8 }
 0x374   : > { %v1067_v10 = vmul.f32 1.442695, %v1061_v9 }
 0x375   : > { %v1058_v11 = vpop.xlane.xlu0 %1057 }
 0x376   : > { %1923 = vpow2.f32 %v1067_v10  ;;  %v1062_v12 = vsub.f32 %v1043_v58, %v1058_v11 }
 0x378   : > { %v1069_v13 = vmul.f32 1.442695, %v1062_v12 }
 0x379   : > { %v740_v14 = vld [vmem:[#allocation4 + $0x8] sm:$0xff] }
 0x37a   : > { %1925 = vpow2.f32 %v1069_v13  ;;  %1756 = vmatpush3.msra.mxu1 %v740_v14 }
 0x37b   : > { %1765 = vmatprep.subr.mxu1 %v2178_v1 }
 0x37c   : > { %v1922_v15 = vpop.eup %1921 }
 0x37d   : > { %v1074_v16 = vsel %vm591_vm2, %v1922_v15, 0.0 }
 0x37e   : > { %1075 = vadd.xlane.f32.xlu0 %v1074_v16 }
 0x380   : > { %v1924_v17 = vpop.eup %1923 }
 0x381   : > { %v1077_v18 = vsel %vm591_vm2, %v1924_v17, 0.0 }
 0x382   : > { %1078 = vadd.xlane.f32.xlu1 %v1077_v18 }
 0x384   : > { %v1926_v19 = vpop.eup %1925 }
 0x385   : > { %v1080_v20 = vsel %vm591_vm2, %v1926_v19, 0.0 }
 0x386   : > { %1081 = vadd.xlane.f32.xlu0 %v1080_v20 }
 0x393   : > { %621 = vrot.lane.b32.xlu1 %v2535_v34, %s2181_s27 }
 0x39c   : > { %611 = vrot.lane.b32.xlu0 %v2535_v34, %s2179_s12  ;;  %s2687_s12 = sld [smem:[#allocation22_spill]] }
 0x3a2   : > { %v1073_v21 = vpop.xlane.xlu1 %1072  ;;  %v1655_v53 = vld [vmem:[%s2687_s12] ss:$0 sm:$0xff] }
 0x3a3   : > { %1927 = vrcp.f32 %v1073_v21 }
 0x3ad   : > { %v1928_v22 = vpop.eup %1927 }
 0x3ae   : > { %v1087_v23 = vmul.f32 %v1928_v22, %v1920_v2 }
 0x3b0   : > { %1753 = vmatmul.mubr.msk.f32.vlgmr.msra.gmra.mrb[4].mxu0 %vm591_vm2, %v1087_v23 }
 0x3b1   : > { %1762 = vmatprep.mubr.msk.f32.mxu0 %vm2177_vm0, %v2178_v1 }
 0x40b   : > { %v1076_v24 = vpop.xlane.xlu0 %1075 }
 0x40c   : > { %1929 = vrcp.f32 %v1076_v24 }
 0x40f   : > { %v1079_v25 = vpop.xlane.xlu1 %1078 }
 0x410   : > { %1931 = vrcp.f32 %v1079_v25 }
 0x413   : > { %v622_v26 = vpop.permute.xlu1 %621  ;;  %v1082_v27 = vpop.xlane.xlu0 %1081 }
 0x414   : > { %625 = vst.msk [vmem:[#allocation4 + $0x18] sm:$0xff] %vm591_vm2, %v622_v26  ;;  %1933 = vrcp.f32 %v1082_v27 }
 0x416   : > { %v1930_v28 = vpop.eup %1929 }
 0x417   : > { %v1088_v29 = vmul.f32 %v1930_v28, %v1922_v15  ;;  %v612_v30 = vpop.permute.xlu0 %611 }
 0x418   : > { %615 = vst.msk [vmem:[#allocation4 + $0x10] sm:$0xff] %vm591_vm2, %v612_v30 }
 0x419   : > { %1758 = vmatmul.mubr.msk.f32.vlgmr.msra.gmra.mrb[10].mxu1 %vm591_vm2, %v1088_v29 }
 0x41a   : > { %1767 = vmatprep.mubr.msk.f32.mxu1 %vm2177_vm0, %v2178_v1  ;;  %v1932_v32 = vpop.eup %1931 }
 0x41b   : > { %v742_v31 = vld [vmem:[#allocation4 + $0x18] sm:$0xff]  ;;  %v1089_v34 = vmul.f32 %v1932_v32, %v1924_v17 }
 0x41c   : > { %1766 = vmatpush3.msra.mxu1 %v742_v31 }
 0x41e   : > { %v1934_v33 = vpop.eup %1933 }
 0x41f   : > { %v1090_v35 = vmul.f32 %v1934_v33, %v1926_v19  ;;  %v741_v36 = vld [vmem:[#allocation4 + $0x10] sm:$0xff] }
 0x420   : > { %1761 = vmatpush3.msra.mxu0 %v741_v36 }
 0x421   : > { %1763 = vmatmul.mubr.msk.f32.vlgmr.msra.gmra.mrb[6].mxu0 %vm591_vm2, %v1089_v34  ;;  %1768 = vmatmul.mubr.msk.f32.vlgmr.msra.gmra.mrb[12].mxu1 %vm591_vm2, %v1090_v35 }
 0x422   : > { %1799 = vmatprep.subr.bf16.mxu0 %v2176_v0  ;;  %1778 = vmatprep.mubr.msk.f32.mxu0 %vm2177_vm0, %v2178_v1 }
 0x423   : > { %1801 = vmatpush3.bf16.msra.mxu0 %v1800_v41 }
 0x424   : > { %1802 = vmatprep.subr.bf16.mxu0 %v2176_v0 }
 0x427   : > { %1804 = vmatpush3.bf16.msra.mxu0 %v1803_v44 }
 0x483   : > { %v1160_v37 = vpop.f32.mrb[4].mxu0 }
 0x484   : > { %1383 = vst.msk [vmem:[#allocation5] sm:$0xff] %vm591_vm2, %v1160_v37  ;;  %v1754_v38 = vpop.f32.mrb[5].mxu0 }
 0x4ec   : > { %v1233_v45 = vpop.f32.mrb[10].mxu1 }
 0x4ed   : > { %1385 = vrot.lane.b32.xlu1 %v1233_v45, %s2182_s25  ;;  %v1759_v46 = vpop.f32.mrb[11].mxu1  ;;  %s2602_s25 = scalar_lea.hbm %s2688_s20, %s1658_s8 }
 0x4f4   : > { %v1306_v47 = vpop.f32.mrb[6].mxu0  ;;  %v1379_v1 = vpop.f32.mrb[12].mxu1 }
 0x4f5   : > { %1397 = vrot.lane.b32.xlu1 %v1379_v1, %s2183_s19  ;;  %v1769_v48 = vpop.f32.mrb[13].mxu1  ;;  %1391 = vrot.lane.b32.xlu0 %v1306_v47, %s2184_s22  ;;  %v1764_v49 = vpop.f32.mrb[7].mxu0  ;;  %s1489_s19 = scalar_lea.sflag [#allocation8], %s2474_s1  ;;  %s2081_s22 = sshll.u32 %s2185_s15, 4  ;;  %s2082_s22 = int_to_ptr.vmem [resolvable:$false] %s2081_s22 }
 0x4f6   : > { %s2083_s16 = scalar_lea.vmem %s2082_s22, 256  ;;  %p2084_p0 = scmp.lt.s32.totalorder %s2604_s26, %s2082_s22 }
 0x4f7   : > { %p2085_p7 = scmp.lt.s32.totalorder %s2083_s16, %s2077_s24 }
 0x4f9   : > { %p2086_p5 = por %p2085_p7, %p2084_p0 }
 0x4fb   : > { %p2087_p8 = pnand %p2086_p5, %p2080_p1 }
 0x55f   : > { %v1386_v50 = vpop.permute.xlu1 %1385 }
 0x560   : > { %1389 = vst.msk [vmem:[#allocation5] sm:$0xff] %vm1388_vm3, %v1386_v50 }
 0x567   : > { %v1398_v0 = vpop.permute.xlu1 %1397  ;;  %v1392_v51 = vpop.permute.xlu0 %1391 }
 0x568   : > { %1395 = vst.msk [vmem:[#allocation5] sm:$0xff] %vm1394_vm4, %v1392_v51 }
 0x569   : > { %1401 = vst.msk [vmem:[#allocation5] sm:$0xff] %vm1400_vm5, %v1398_v0 }
 0x570   : > { %v1402_v52 = vld [vmem:[#allocation5] sm:$0xff] }
 0x571   : > { %1779 = vmatmul.mubr.msk.f32.vlgmr.msra.gmra.mrb[8].mxu0 %vm436_vm1, %v1402_v52 }
 0x644   : > { %v1483_v54 = vpop.f32.mrb[8].mxu0 }
 0x645   : > { %v1484_v55 = vadd.f32 %v1655_v53, %v1483_v54  ;;  %v1780_v56 = vpop.f32.mrb[9].mxu0 }
 0x647   : > { %1487 = vst.msk [vmem:[%s419_s9] sm:$0xff] %vm436_vm1, %v1484_v55 }
 0x648   : > { %2090 = shalt.err (!%p2087_p8)
}
 0x649   : > { %s2091_s1 = scalar_lea.hbm %s2602_s25, 128  ;;  %s2095_s8 = scalar_lea.hbm %s2688_s20, 256 }
 0x64a   : > { %p2092_p3 = scmp.ne.s32.totalorder %s2602_s25, %s2091_s1  ;;  %p2096_p13 = scmp.lt.u32.totalorder %s2602_s25, %s2688_s20 }
 0x64b   : > { %p2097_p12 = scmp.lt.u32.totalorder %s2095_s8, %s2091_s1  ;;  %p2099_p2 = scmp.lt.u32.totalorder %s2091_s1, %s2602_s25 }
 0x64c   : > { %p2093_p11 = pnand %p2092_p3, %p2689_p9 }
 0x64d   : > { %p2098_p4 = por %p2097_p12, %p2096_p13 }
 0x64e   : > { %p2094_p6 = pneg %p2093_p11 }
 0x64f   : > { %p2100_p10 = por %p2099_p2, %p2098_p4 }
 0x651   : > { %p2101_p1 = pnand %p2100_p10, %p2094_p6 }
 0x653   : > { %2104 = shalt.err (!%p2101_p1)
}
 0x654   : > { %1823 = dma.vmem_to_hbm [thread:$0]  (%p2689_p9), %s2604_s26, 128, %s2602_s25, %s1489_s19  }
 0x655 PF: > { %s1515_s23 = sand.u32 1, %s2147_s30   ;;  %p2690_p0 = scmp.ne.s32.totalorder %s2682_s21, 0 }
 0x656   : > { %p2691_p7 = scmp.ge.s32.totalorder %s2167_s14, 2  ;;  %s1516_s24 = scalar_lea.sflag [#allocation8], %s1515_s23 }
 0x658   : > { %p1843_p5 = pnand %p2691_p7, %p2690_p0 }
 0x65a   : > { %2142 = dma.done.wait (!%p1843_p5), %s1516_s24, 128  }
 0x65b   : > { %2144 = vsyncadd (!%p1843_p5), %s1516_s24, 4294967168  ;;  %s27_s14 = sadd.s32 1, %s2167_s14   ;;  %s2692_s30 = smov %s2151_s10 }
 0x65c   : > { %p24_p8 = scmp.ge.s32.totalorder %s27_s14, 4   ;;  %s2693_s10 = smov %s2155_s11 }
 0x65d   : > { %s2694_s11 = smov %s2424_s29  ;;  %s2695_s12 = smov %s2163_s13 }
 0x65e   : > { %s2696_s13 = smov %s2698_s18  ;;  %26 = sbr.rel (!%p24_p8) target bundleno = 12 (0xc), region = 130 }
 0x665   :  { %1521 = vsyncpa [#allocation7], 1 }
 0x666   :  { %1523 = vsyncpa [#allocation7 + $0x1], 1 }
 0x667   :  { %1524 = vsyncpa [#allocation10], 1 }
 0x668   :  { %1525 = vsyncpa [#allocation13], 1 }
 0x669   :  { %1526 = vsyncpa [#allocation8], 1 }
 0x66a   :  { %1528 = vsyncpa [#allocation8 + $0x1], 1 }

// kernel: tpu_custom_call.1
= control target key start
LH: loop header
LB: loop body
LE: loop exit
PB: predicated region body
PF: predicated region fallthrough
CT: control target
= control target key end

     0   :  { %s2652_s0 = inlined_call_operand.hbm [shape: f32[2,8,32], index: 0, kind: input, shape index: {}]   ;;  %s2653_s1 = inlined_call_operand.hbm [shape: f32[32,32], index: 1, kind: input, shape index: {}]   ;;  %s2654_s2 = inlined_call_operand.hbm [shape: f32[32,32], index: 2, kind: input, shape index: {}]   ;;  %s2655_s3 = inlined_call_operand.hbm [shape: f32[32,32], index: 3, kind: input, shape index: {}]   ;;  %s2656_s4 = inlined_call_operand.vmem [shape: f32[1,32], index: 4, kind: input, shape index: {}]   ;;  %s2657_s5 = inlined_call_operand.vmem [shape: f32[1,32], index: 5, kind: input, shape index: {}]   ;;  %s2658_s6 = inlined_call_operand.vmem [shape: f32[1,32], index: 6, kind: input, shape index: {}]   ;;  %s2659_s7 = inlined_call_operand.hbm [shape: f32[32,32], index: 7, kind: input, shape index: {}]   ;;  %s2660_s8 = inlined_call_operand.vmem [shape: f32[1,32], index: 8, kind: input, shape index: {}]   ;;  %s2661_s9 = inlined_call_operand.hbm [shape: f32[2,8,32], index: 9, kind: output, shape index: {}]  }
   0x1   :  { %2668 = sst [smem:[#allocation21_spill]] %s2653_s1 }
   0x2   :  { %2669 = sst [smem:[#allocation22_spill]] %s2660_s8 }
   0x3   :  { %2670 = sst [smem:[#allocation23_spill]] %s2661_s9 }
   0x4   :  { %14 = vsyncpa [#allocation7], 0 }
   0x5   :  { %16 = vsyncpa [#allocation7 + $0x1], 0 }
   0x6   :  { %17 = vsyncpa [#allocation10], 0 }
   0x7   :  { %18 = vsyncpa [#allocation13], 0 }
   0x8   :  { %19 = vsyncpa [#allocation8], 0 }
   0x9   :  { %21 = vsyncpa [#allocation8 + $0x1], 0  ;;  %s2236_s30 = smov 0   ;;  %s2238_s10 = smov 0  }
   0xa   :  { %s2240_s11 = smov 0   ;;  %s2242_s12 = smov 0  }
   0xb   :  { %s2244_s13 = smov 0   ;;  %s2246_s14 = smov 0  }
   0xc LB: > { %2671 = sst [smem:[#allocation20_spill]] %s2159_s12  ;;  %s2662_s15 = sadd.s32 4294967295, %s2167_s14   ;;  %s2167_s14 = sphi %s2246_s14, %s27_s14   ;;  %s2163_s13 = sphi %s2244_s13, %s2696_s13   ;;  %s2159_s12 = sphi %s2242_s12, %s2695_s12   ;;  %s2155_s11 = sphi %s2240_s11, %s2694_s11   ;;  %s2151_s10 = sphi %s2238_s10, %s2693_s10   ;;  %s2147_s30 = sphi %s2236_s30, %s2692_s30  }
   0xd   : > { %p1622_p0 = scmp.ge.s32.totalorder %s2167_s14, 1  ;;  %p2270_p1 = scmp.eq.s32.totalorder %s2662_s15, 0 }
   0xe   : > { %p266_p2 = scmp.lt.s32.totalorder %s2167_s14, 3  ;;  %s2169_s18 = smov [#allocation9]  }
   0xf   : > { %s2672_s16 = scalar_select %p2270_p1, 1, 0 }
  0x10   : > { %p2275_p3 = pnand %p1622_p0, %p266_p2  ;;  %s278_s19 = sshll.u32 %s2169_s18, 4  ;;  %s2279_s19 = int_to_ptr.vmem [resolvable:$true] %s278_s19 }
  0x11   : > { %s2170_s21 = smov [#allocation12]   ;;  %s2171_s23 = smov [#allocation11]  }
  0x12   : > { %s2673_s17 = scalar_select %p2275_p3, 1, 0 }
  0x13   : > { %p1825_p4 = pneg %p2275_p3  ;;  %s304_s22 = sshll.u32 %s2170_s21, 4  ;;  %s2290_s22 = int_to_ptr.vmem [resolvable:$true] %s304_s22 }
  0x14   : > { %s2292_s24 = sshll.u32 %s2171_s23, 4  ;;  %s2675_s1 = sld [smem:[#allocation21_spill]]  ;;  %s292_s24 = int_to_ptr.vmem [resolvable:$true] %s2292_s24 }
  0x15   : > { %p2286_p6 = pnand %p1825_p4, %p2270_p1 }
  0x17   : > { %p2302_p8 = pneg %p2286_p6 }
  0x1a   : > { %s1935_s27 = scalar_lea.hbm %s2675_s1, 512 }
  0x1b   : > { %p1936_p7 = scmp.ne.s32.totalorder %s2675_s1, %s1935_s27  ;;  %p1942_p11 = scmp.lt.u32.totalorder %s1935_s27, %s2675_s1 }
  0x1d   : > { %p1938_p9 = pnand %p2302_p8, %p1936_p7 }
  0x1f   : > { %p1939_p10 = pneg %p1938_p9 }
  0x21   : > { %p1944_p12 = pnand %p1942_p11, %p1939_p10 }
  0x23   : > { %1947 = shalt.err (!%p1944_p12)
}
  0x24   : > { %s1948_s25 = scalar_lea.vmem %s2279_s19, 512  ;;  %p1956_p4 = scmp.lt.s32.totalorder %s2279_s19, %s2279_s19 }
  0x25   : > { %p1949_p13 = scmp.ne.s32.totalorder %s2279_s19, %s1948_s25  ;;  %p1957_p5 = scmp.lt.s32.totalorder %s1948_s25, %s1948_s25 }
  0x27   : > { %p1951_p0 = pnand %p1949_p13, %p2302_p8  ;;  %p1958_p7 = por %p1957_p5, %p1956_p4 }
  0x29   : > { %p1952_p2 = pneg %p1951_p0 }
  0x2b   : > { %p1959_p9 = pnand %p1958_p7, %p1952_p2 }
  0x2d   : > { %1962 = shalt.err (!%p1959_p9)
}
  0x2e   : > { %s2172_s26 = smov 128   ;;  %s2173_s27 = smov 8  }
  0x2f   : > { %1828 = dma.hbm_to_vmem [thread:$0]  (!%p2286_p6), %s2675_s1, 512, %s2279_s19, [#allocation10], %s2172_s26, %s2172_s26, %s2173_s27  }
  0x30   : > { %s1963_s25 = scalar_lea.hbm %s2655_s3, 512 }
  0x31   : > { %p1964_p5 = scmp.ne.s32.totalorder %s2655_s3, %s1963_s25  ;;  %p1970_p12 = scmp.lt.u32.totalorder %s1963_s25, %s2655_s3 }
  0x33   : > { %p1966_p10 = pnand %p1964_p5, %p2302_p8 }
  0x35   : > { %p1967_p11 = pneg %p1966_p10 }
  0x37   : > { %p1972_p13 = pnand %p1970_p12, %p1967_p11 }
  0x39   : > { %1975 = shalt.err (!%p1972_p13)
}
  0x3a   : > { %s1976_s19 = scalar_lea.vmem %s2290_s22, 512  ;;  %p1984_p7 = scmp.lt.s32.totalorder %s2290_s22, %s2290_s22 }
  0x3b   : > { %p1977_p0 = scmp.ne.s32.totalorder %s2290_s22, %s1976_s19  ;;  %p1985_p9 = scmp.lt.s32.totalorder %s1976_s19, %s1976_s19 }
  0x3d   : > { %p1979_p2 = pnand %p1977_p0, %p2302_p8  ;;  %p1986_p5 = por %p1985_p9, %p1984_p7 }
  0x3f   : > { %p1980_p4 = pneg %p1979_p2 }
  0x41   : > { %p1987_p10 = pnand %p1986_p5, %p1980_p4 }
  0x43   : > { %1990 = shalt.err (!%p1987_p10)
}
  0x44   : > { %1834 = dma.hbm_to_vmem [thread:$0]  (!%p2286_p6), %s2655_s3, 512, %s2290_s22, [#allocation13], %s2172_s26, %s2172_s26, %s2173_s27  }
  0x45   : > { %s1991_s28 = scalar_lea.hbm %s2654_s2, 512 }
  0x46   : > { %p1992_p11 = scmp.ne.s32.totalorder %s2654_s2, %s1991_s28  ;;  %p1998_p0 = scmp.lt.u32.totalorder %s1991_s28, %s2654_s2 }
  0x48   : > { %p1994_p12 = pnand %p1992_p11, %p2302_p8 }
  0x4a   : > { %p1995_p13 = pneg %p1994_p12 }
  0x4c   : > { %p2000_p2 = pnand %p1998_p0, %p1995_p13 }
  0x4e   : > { %2003 = shalt.err (!%p2000_p2)
}
  0x4f   : > { %s2004_s19 = scalar_lea.vmem %s292_s24, 512  ;;  %p2012_p5 = scmp.lt.s32.totalorder %s292_s24, %s292_s24 }
  0x50   : > { %p2005_p4 = scmp.ne.s32.totalorder %s292_s24, %s2004_s19  ;;  %p2013_p10 = scmp.lt.s32.totalorder %s2004_s19, %s2004_s19 }
  0x52   : > { %p2007_p7 = pnand %p2005_p4, %p2302_p8  ;;  %p2014_p3 = por %p2013_p10, %p2012_p5 }
  0x54   : > { %p2008_p9 = pneg %p2007_p7 }
  0x56   : > { %p2015_p1 = pnand %p2014_p3, %p2008_p9 }
  0x58   : > { %2018 = shalt.err (!%p2015_p1)
}
  0x59   : > { %1831 = dma.hbm_to_vmem [thread:$0]  (!%p2286_p6), %s2654_s2, 512, %s292_s24, [#allocation10], %s2172_s26, %s2172_s26, %s2173_s27  }
  0x5a   : > { %s2174_s9 = smov [#allocation14]   ;;  %s2019_s29 = scalar_lea.hbm %s2659_s7, 512 }
  0x5b   : > { %s326_s12 = sshll.u32 %s2174_s9, 4  ;;  %p2020_p1 = scmp.ne.s32.totalorder %s2659_s7, %s2019_s29  ;;  %s327_s12 = int_to_ptr.vmem [resolvable:$true] %s326_s12 }
  0x5c   : > { %p2026_p12 = scmp.lt.u32.totalorder %s2019_s29, %s2659_s7 }
  0x5d   : > { %p2022_p3 = pnand %p2020_p1, %p2302_p8 }
  0x5f   : > { %p2023_p11 = pneg %p2022_p3 }
  0x61   : > { %p2028_p13 = pnand %p2026_p12, %p2023_p11 }
  0x63   : > { %2031 = shalt.err (!%p2028_p13)
}
  0x64   : > { %s2032_s24 = scalar_lea.vmem %s327_s12, 512  ;;  %p2040_p7 = scmp.lt.s32.totalorder %s327_s12, %s327_s12 }
  0x65   : > { %p2033_p0 = scmp.ne.s32.totalorder %s327_s12, %s2032_s24  ;;  %p2041_p9 = scmp.lt.s32.totalorder %s2032_s24, %s2032_s24 }
  0x67   : > { %p2035_p2 = pnand %p2033_p0, %p2302_p8  ;;  %p2042_p5 = por %p2041_p9, %p2040_p7 }
  0x69   : > { %p2036_p4 = pneg %p2035_p2 }
  0x6b   : > { %p2043_p10 = pnand %p2042_p5, %p2036_p4 }
  0x6d   : > { %2046 = shalt.err (!%p2043_p10)
}
  0x6e   : > { %1837 = dma.hbm_to_vmem [thread:$0]  (!%p2286_p6), %s2659_s7, 512, %s327_s12, [#allocation13], %s2172_s26, %s2172_s26, %s2173_s27  }
  0x6f   : > { %s1621_s20 = sadd.s32 4294967294, %s2167_s14   ;;  %s39_s18 = sadd.s32 1, %s2163_s13 }
  0x70   : > { %p41_p8 = scmp.ge.s32.totalorder %s39_s18, 2  ;;  %s46_s9 = sadd.s32 1, %s2155_s11 }
  0x71   : > { %p53_p1 = scmp.ne.s32.totalorder %s2155_s11, %s2151_s10  ;;  %p54_p3 = scmp.eq.s32.totalorder %s2167_s14, 0 }
  0x72   : > { %s2698_s18 = smov (%p41_p8, %s39_s18), 0  ;;  %p59_p12 = scmp.ne.s32.totalorder %s2151_s10, %s2147_s30 }
  0x73   : > { %p2403_p11 = por %p54_p3, %p53_p1  ;;  %s43_s26 = ssub.s32 %s2163_s13, %s2698_s18 }
  0x74   : > { %s2678_s27 = sadd.s32 4294967295, %s2167_s14   ;;  %p44_p13 = scmp.eq.s32.totalorder %s43_s26, 0 }
  0x75   : > { %p253_p6 = scmp.eq.s32.totalorder %s2678_s27, 1  ;;  %p2679_p0 = scmp.ne.s32.totalorder %s2672_s16, 0 }
  0x76   : > { %p259_p7 = scmp.eq.s32.totalorder %s1621_s20, 1  ;;  %p1850_p5 = scmp.lt.s32.totalorder %s2167_s14, 2 }
  0x77   : > { %p2415_p2 = por %p2679_p0, %p59_p12  ;;  %p2419_p4 = por %p253_p6, %p53_p1 }
  0x78   : > { %s2424_s29 = scalar_select %p44_p13, %s2155_s11, %s46_s9  }
  0x79   : > { %s2681_s28 = scalar_select %p2419_p4, 1, 0 }
  0x7a   : > { %p2426_p9 = por %p259_p7, %p59_p12  ;;  %s343_s23 = sand.u32 1, %s2155_s11  }
  0x7b   : > { %s1629_s25 = sshll.u32 %s2163_s13, 7  ;;  %s1628_s19 = sshll.u32 %s343_s23, 3 }
  0x7c   : > { %s2682_s21 = scalar_select %p2426_p9, 1, 0 }
  0x7d   : > { %s2436_s8 = scalar_lea.hbm %s2652_s0, %s1629_s25  ;;  %s347_s20 = scalar_lea.vmem [#allocation6], %s1628_s19 }
  0x7e   : > { %s354_s9 = sshll.u32 %s347_s20, 4  ;;  %p2440_p10 = pnand %p1850_p5, %p2403_p11  ;;  %s2444_s9 = int_to_ptr.vmem [resolvable:$true] %s354_s9 }
  0x7f   : > { %s344_s27 = scalar_lea.sflag [#allocation7], %s343_s23  ;;  %s2047_s1 = scalar_lea.hbm %s2436_s8, 128 }
  0x80   : > { %p2048_p8 = scmp.ne.s32.totalorder %s2436_s8, %s2047_s1  ;;  %p2049_p1 = pneg %p2440_p10 }
  0x81   : > { %s2052_s15 = scalar_lea.hbm %s2652_s0, 256  ;;  %p2053_p11 = scmp.lt.u32.totalorder %s2436_s8, %s2652_s0 }
  0x82   : > { %p2050_p3 = pnand %p2049_p1, %p2048_p8  ;;  %p2054_p6 = scmp.lt.u32.totalorder %s2052_s15, %s2047_s1 }
  0x83   : > { %p2056_p0 = scmp.lt.u32.totalorder %s2047_s1, %s2436_s8 }
  0x84   : > { %p2051_p12 = pneg %p2050_p3  ;;  %p2055_p13 = por %p2054_p6, %p2053_p11 }
  0x86   : > { %p2057_p7 = por %p2056_p0, %p2055_p13 }
  0x88   : > { %p2058_p5 = pnand %p2057_p7, %p2051_p12 }
  0x8a   : > { %2061 = shalt.err (!%p2058_p5)
}
  0x8b   : > { %s2062_s23 = scalar_lea.vmem %s2444_s9, 128  ;;  %s2175_s20 = smov [#allocation6]  }
  0x8c   : > { %p2063_p8 = scmp.ne.s32.totalorder %s2444_s9, %s2062_s23  ;;  %s2067_s25 = sshll.u32 %s2175_s20, 4  ;;  %s2068_s25 = int_to_ptr.vmem [resolvable:$false] %s2067_s25 }
  0x8d   : > { %s2069_s19 = scalar_lea.vmem %s2068_s25, 256  ;;  %p2070_p4 = scmp.lt.s32.totalorder %s2444_s9, %s2068_s25 }
  0x8e   : > { %p2065_p3 = pnand %p2063_p8, %p2049_p1  ;;  %p2071_p11 = scmp.lt.s32.totalorder %s2069_s19, %s2062_s23 }
  0x90   : > { %p2066_p9 = pneg %p2065_p3  ;;  %p2072_p6 = por %p2071_p11, %p2070_p4 }
  0x92   : > { %p2073_p13 = pnand %p2072_p6, %p2066_p9 }
  0x94   : > { %2076 = shalt.err (!%p2073_p13)
}
  0x95   : > { %1841 = dma.hbm_to_vmem [thread:$0]  (!%p2440_p10), %s2436_s8, 128, %s2444_s9, %s344_s27  }
  0x96   : > { %p2684_p12 = scmp.ne.s32.totalorder %s2673_s17, 0 }
  0x97   : > { %s2474_s1 = sand.u32 (!%p2684_p12), 1, %s2151_s10  }
  0x98   : > { %363 = sbr.rel (%p2684_p12) target bundleno = 1621 (0x655), region = 56  ;;  %s1631_s15 = sshll.u32 (!%p2684_p12), %s2474_s1, 3 }
  0x99   : > { %s366_s24 = scalar_lea.sflag (!%p2684_p12), [#allocation7], %s2474_s1  ;;  %s369_s22 = scalar_lea.vmem (!%p2684_p12), [#allocation6], %s1631_s15 }
  0x9f   : > { %2130 = dma.done.wait (%p2415_p2), %s366_s24, 128  }
  0xa0   : > { %2132 = vsyncadd (%p2415_p2), %s366_s24, 4294967168  ;;  %p2685_p4 = scmp.ne.s32.totalorder %s2672_s16, 0 }
  0xa2   : > { %2134 = dma.done.wait (%p2685_p4), [#allocation10], 1024  }
  0xa3   : > { %2136 = vsyncadd (%p2685_p4), [#allocation10], 4294966272 }
  0xa4   : > { %2138 = dma.done.wait (%p2685_p4), [#allocation13], 1024  }
  0xa5   : > { %2140 = vsyncadd (%p2685_p4), [#allocation13], 4294966272  ;;  %v2176_v0 = vmov 0.0|0.0   ;;  %vm2177_vm0 = vmmov 0   ;;  %v2178_v1 = vmov 0.0   ;;  %v425_v2 = vld [vmem:[#allocation11] sm:$0xff] }
  0xa6   : > { %1781 = vmatprep.subr.bf16.mxu0 %v2176_v0  ;;  %1705 = vmatprep.mubr.msk.f32.mxu0 %vm2177_vm0, %v2178_v1  ;;  %v426_v3 = vld [vmem:[#allocation11 + $0x8] sm:$0xff]  ;;  %v427_v4 = vld [vmem:[#allocation11 + $0x10] sm:$0xff]  ;;  %v428_v6 = vld [vmem:[#allocation11 + $0x18] sm:$0xff]  ;;  %vm436_vm1 = vcmask 261120   ;;  %vm591_vm2 = vcmask 64512   ;;  %s2179_s12 = smov 112  }
  0xa7   : > { %1787 = vmatprep.subr.bf16.mxu1 %v2176_v0  ;;  %1716 = vmatprep.mubr.msk.f32.mxu1 %vm2177_vm0, %v2178_v1  ;;  %v1782_v5 = vpack.c.bf16 %v426_v3, %v425_v2  ;;  %v1785_v7 = vpack.c.bf16 %v428_v6, %v427_v4  ;;  %v510_v8 = vld [vmem:[#allocation12] sm:$0xff]  ;;  %v511_v9 = vld [vmem:[#allocation12 + $0x8] sm:$0xff]  ;;  %v424_v13 = vld [vmem:[%s369_s22] sm:$0xff]  ;;  %s2180_s8 = smov 120   ;;  %s2181_s27 = smov 104   ;;  %vm1388_vm3 = vcmask 130112  }
  0xa8   : > { %v627_v10 = vld [vmem:[#allocation9] sm:$0xff]  ;;  %v628_v11 = vld [vmem:[#allocation9 + $0x8] sm:$0xff]  ;;  %v1788_v12 = vpack.c.bf16 %v511_v9, %v510_v8  ;;  %v629_v15 = vld [vmem:[#allocation9 + $0x10] sm:$0xff]  ;;  %s2182_s25 = smov 8   ;;  %s2183_s19 = smov 24   ;;  %vm1394_vm4 = vcmask 195712  }
  0xa9   : > { %1783 = vmatpush3.bf16.msra.mxu0 %v1782_v5  ;;  %v1794_v14 = vpack.c.bf16 %v628_v11, %v627_v10  ;;  %v630_v16 = vld [vmem:[#allocation9 + $0x18] sm:$0xff]  ;;  %v512_v18 = vld [vmem:[#allocation12 + $0x10] sm:$0xff]  ;;  %v1637_v21 = vld [vmem:[%s2657_s5] ss:$0 sm:$0xff]  ;;  %s2686_s24 = sld [smem:[#allocation20_spill]]  ;;  %s2184_s22 = smov 16  }
  0xaa   : > { %1784 = vmatprep.subr.bf16.mxu0 %v2176_v0  ;;  %1789 = vmatpush3.bf16.msra.mxu1 %v1788_v12  ;;  %v1797_v17 = vpack.c.bf16 %v630_v16, %v629_v15  ;;  %v513_v19 = vld [vmem:[#allocation12 + $0x18] sm:$0xff]  ;;  %v1641_v25 = vld [vmem:[%s2656_s4] ss:$0 sm:$0xff]  ;;  %vm1400_vm5 = vcmask 261312   ;;  %s419_s9 = scalar_lea.vmem [#allocation15], %s1631_s15  ;;  %s2688_s20 = sld [smem:[#allocation23_spill]] }
  0xab   : > { %1790 = vmatprep.subr.bf16.mxu1 %v2176_v0  ;;  %v1791_v20 = vpack.c.bf16 %v513_v19, %v512_v18  ;;  %v1639_v32 = vld [vmem:[%s2658_s6] ss:$0 sm:$0xff]  ;;  %s1503_s26 = sshll.u32 %s419_s9, 4  ;;  %p2689_p9 = scmp.ne.s32.totalorder %s2681_s28, 0  ;;  %s2604_s26 = int_to_ptr.vmem [resolvable:$true] %s1503_s26 }
  0xac   : > { %s2185_s15 = smov [#allocation15]  }
  0xad   : > { %1786 = vmatpush3.bf16.msra.mxu0 %v1785_v7 }
  0xae   : > { %1793 = vmatprep.subr.bf16.mxu0 %v2176_v0  ;;  %1792 = vmatpush3.bf16.msra.mxu1 %v1791_v20 }
  0xaf   : > { %1730 = vmatprep.subr.mxu1 %v2178_v1 }
  0xb0   : > { %1706 = vmatmul.mubr.msk.f32.vlgmr.msra.gmra.mrb[0].mxu0 %vm436_vm1, %v424_v13 }
  0xb1   : > { %1795 = vmatpush3.bf16.msra.mxu0 %v1794_v14  ;;  %1727 = vmatprep.mubr.msk.f32.mxu0 %vm2177_vm0, %v2178_v1 }
  0xb2   : > { %1796 = vmatprep.subr.bf16.mxu0 %v2176_v0  ;;  %1717 = vmatmul.mubr.msk.f32.vlgmr.msra.gmra.mrb[0].mxu1 %vm436_vm1, %v424_v13 }
  0xb3   : > { %1732 = vmatprep.mubr.msk.f32.mxu1 %vm2177_vm0, %v2178_v1 }
  0xb5   : > { %1798 = vmatpush3.bf16.msra.mxu0 %v1797_v17 }
  0xb6   : > { %1750 = vmatprep.subr.mxu0 %v2178_v1 }
  0xb8   : > { %1728 = vmatmul.mubr.msk.f32.vlgmr.msra.gmra.mrb[2].mxu0 %vm436_vm1, %v424_v13 }
  0xb9   : > { %1752 = vmatprep.mubr.msk.f32.mxu0 %vm2177_vm0, %v2178_v1 }
 0x183   : > { %v506_v22 = vpop.f32.mrb[0].mxu0 }
 0x184   : > { %v507_v23 = vadd.f32 %v1637_v21, %v506_v22  ;;  %v1707_v24 = vpop.f32.mrb[1].mxu0 }
 0x185   : > { %v587_v33 = vpop.f32.mrb[0].mxu1 }
 0x186   : > { %592 = vst.msk [vmem:[#allocation3] sm:$0xff] %vm591_vm2, %v507_v23  ;;  %606 = vrot.lane.b32.xlu1 %v507_v23, %s2179_s12  ;;  %595 = vrot.lane.b32.xlu0 %v507_v23, %s2180_s8  ;;  %v2535_v34 = vadd.f32 %v1639_v32, %v587_v33  ;;  %v1718_v35 = vpop.f32.mrb[1].mxu1 }
 0x188   : > { %593 = vst.msk [vmem:[#allocation4] sm:$0xff] %vm591_vm2, %v2535_v34 }
 0x18b   : > { %v708_v26 = vpop.f32.mrb[2].mxu0 }
 0x18c   : > { %v709_v27 = vadd.f32 %v1641_v25, %v708_v26  ;;  %v1729_v28 = vpop.f32.mrb[3].mxu0 }
 0x18d   : > { %v735_v29 = vld [vmem:[#allocation3] sm:$0xff] }
 0x18e   : > { %v712_v30 = vmul.f32 0.35355338, %v709_v27  ;;  %1731 = vmatpush3.xpose.msk.msra.mxu1 %vm591_vm2, %v735_v29 }
 0x18f   : > { %1735 = vmatprep.subr.mxu1 %v2178_v1  ;;  %v739_v48 = vld [vmem:[#allocation4] sm:$0xff] }
 0x190   : > { %714 = vst.msk [vmem:[#allocation2] sm:$0xff] %vm591_vm2, %v712_v30  ;;  %721 = vrot.lane.b32.xlu1 %v712_v30, %s2179_s12  ;;  %716 = vrot.lane.b32.xlu0 %v712_v30, %s2180_s8 }
 0x191   : > { %1751 = vmatpush3.msra.mxu0 %v739_v48 }
 0x192   : > { %1760 = vmatprep.subr.mxu0 %v2178_v1 }
 0x194   : > { %726 = vrot.lane.b32.xlu1 %v712_v30, %s2181_s27  ;;  %616 = vrot.lane.b32.xlu0 %v507_v23, %s2181_s27 }
 0x197   : > { %v731_v31 = vld [vmem:[#allocation2] sm:$0xff] }
 0x198   : > { %1733 = vmatmul.mubr.msk.f32.vlgmr.msra.gmra.mrb[2].mxu1 %vm591_vm2, %v731_v31 }
 0x199   : > { %1737 = vmatprep.mubr.msk.f32.mxu1 %vm2177_vm0, %v2178_v1 }
 0x1f8   : > { %v607_v36 = vpop.permute.xlu1 %606  ;;  %v596_v37 = vpop.permute.xlu0 %595 }
 0x1f9   : > { %610 = vst.msk [vmem:[#allocation3 + $0x10] sm:$0xff] %vm591_vm2, %v607_v36  ;;  %599 = vst.msk [vmem:[#allocation3 + $0x8] sm:$0xff] %vm591_vm2, %v596_v37 }
 0x200   : > { %v736_v38 = vld [vmem:[#allocation3 + $0x8] sm:$0xff]  ;;  %v737_v44 = vld [vmem:[#allocation3 + $0x10] sm:$0xff] }
 0x201   : > { %1736 = vmatpush3.xpose.msk.msra.mxu1 %vm591_vm2, %v736_v38 }
 0x202   : > { %v722_v39 = vpop.permute.xlu1 %721  ;;  %v717_v40 = vpop.permute.xlu0 %716  ;;  %1740 = vmatprep.subr.mxu1 %v2178_v1 }
 0x203   : > { %725 = vst.msk [vmem:[#allocation2 + $0x10] sm:$0xff] %vm591_vm2, %v722_v39  ;;  %720 = vst.msk [vmem:[#allocation2 + $0x8] sm:$0xff] %vm591_vm2, %v717_v40  ;;  %v1403_v39 = vld [vmem:[#allocation14] sm:$0xff]  ;;  %v1404_v40 = vld [vmem:[#allocation14 + $0x8] sm:$0xff] }
 0x206   : > { %v727_v41 = vpop.permute.xlu1 %726  ;;  %v617_v42 = vpop.permute.xlu0 %616 }
 0x207   : > { %730 = vst.msk [vmem:[#allocation2 + $0x18] sm:$0xff] %vm591_vm2, %v727_v41  ;;  %620 = vst.msk [vmem:[#allocation3 + $0x18] sm:$0xff] %vm591_vm2, %v617_v42  ;;  %v1800_v41 = vpack.c.bf16 %v1404_v40, %v1403_v39  ;;  %v1405_v42 = vld [vmem:[#allocation14 + $0x10] sm:$0xff] }
 0x20a   : > { %v732_v43 = vld [vmem:[#allocation2 + $0x8] sm:$0xff]  ;;  %v733_v45 = vld [vmem:[#allocation2 + $0x10] sm:$0xff] }
 0x20b   : > { %1738 = vmatmul.mubr.msk.f32.vlgmr.msra.gmra.mrb[4].mxu1 %vm591_vm2, %v732_v43  ;;  %v1406_v43 = vld [vmem:[#allocation14 + $0x18] sm:$0xff] }
 0x20c   : > { %1741 = vmatpush3.xpose.msk.msra.mxu1 %vm591_vm2, %v737_v44  ;;  %1742 = vmatprep.mubr.msk.f32.mxu1 %vm2177_vm0, %v2178_v1  ;;  %v1803_v44 = vpack.c.bf16 %v1406_v43, %v1405_v42 }
 0x20d   : > { %1745 = vmatprep.subr.mxu1 %v2178_v1 }
 0x20e   : > { %v738_v46 = vld [vmem:[#allocation3 + $0x18] sm:$0xff] }
 0x20f   : > { %1743 = vmatmul.mubr.msk.f32.vlgmr.msra.gmra.mrb[6].mxu1 %vm591_vm2, %v733_v45  ;;  %v734_v47 = vld [vmem:[#allocation2 + $0x18] sm:$0xff] }
 0x210   : > { %1746 = vmatpush3.xpose.msk.msra.mxu1 %vm591_vm2, %v738_v46  ;;  %1747 = vmatprep.mubr.msk.f32.mxu1 %vm2177_vm0, %v2178_v1 }
 0x211   : > { %1755 = vmatprep.subr.mxu1 %v2178_v1 }
 0x213   : > { %1748 = vmatmul.mubr.msk.f32.vlgmr.msra.gmra.mrb[8].mxu1 %vm591_vm2, %v734_v47 }
 0x214   : > { %1757 = vmatprep.mubr.msk.f32.mxu1 %vm2177_vm0, %v2178_v1 }
 0x26b   : > { %v815_v49 = vpop.f32.mrb[2].mxu1 }
 0x26c   : > { %v1734_v50 = vpop.f32.mrb[3].mxu1  ;;  %v1047_v51 = vsel %vm591_vm2, %v815_v49, -inf }
 0x26d   : > { %1048 = vmax.xlane.f32.xlu0 %v1047_v51 }
 0x2de   : > { %v891_v52 = vpop.f32.mrb[4].mxu1 }
 0x2df   : > { %v1739_v53 = vpop.f32.mrb[5].mxu1  ;;  %v1050_v54 = vsel %vm591_vm2, %v891_v52, -inf }
 0x2e0   : > { %1051 = vmax.xlane.f32.xlu1 %v1050_v54 }
 0x2e2   : > { %v967_v55 = vpop.f32.mrb[6].mxu1 }
 0x2e3   : > { %v1744_v56 = vpop.f32.mrb[7].mxu1  ;;  %v1053_v57 = vsel %vm591_vm2, %v967_v55, -inf }
 0x2e4   : > { %1054 = vmax.xlane.f32.xlu0 %v1053_v57 }
 0x2e6   : > { %v1043_v58 = vpop.f32.mrb[8].mxu1 }
 0x2e7   : > { %v1749_v59 = vpop.f32.mrb[9].mxu1  ;;  %v1056_v60 = vsel %vm591_vm2, %v1043_v58, -inf }
 0x2e8   : > { %1057 = vmax.xlane.f32.xlu0 %v1056_v60 }
 0x2f1   : > { %601 = vrot.lane.b32.xlu1 %v2535_v34, %s2180_s8  ;;  %s1658_s8 = sshll.u32 %s2686_s24, 7  ;;  %s2077_s24 = scalar_lea.vmem %s2604_s26, 128 }
 0x2f2   : > { %p2078_p2 = scmp.ne.s32.totalorder %s2604_s26, %s2077_s24 }
 0x2f4   : > { %p2079_p10 = pnand %p2078_p2, %p2689_p9 }
 0x2f6   : > { %p2080_p1 = pneg %p2079_p10 }
 0x2fa   : > { %v1049_v61 = vpop.xlane.xlu0 %1048 }
 0x2fb   : > { %v1059_v62 = vsub.f32 %v815_v49, %v1049_v61 }
 0x2fd   : > { %v1063_v63 = vmul.f32 1.442695, %v1059_v62 }
 0x2ff   : > { %1919 = vpow2.f32 %v1063_v63 }
 0x309   : > { %v1920_v2 = vpop.eup %1919 }
 0x30a   : > { %v1071_v3 = vsel %vm591_vm2, %v1920_v2, 0.0 }
 0x315   : > { %1072 = vadd.xlane.f32.xlu1 %v1071_v3 }
 0x36d   : > { %v1052_v4 = vpop.xlane.xlu1 %1051 }
 0x36e   : > { %v1060_v5 = vsub.f32 %v891_v52, %v1052_v4 }
 0x370   : > { %v1065_v6 = vmul.f32 1.442695, %v1060_v5 }
 0x371   : > { %v602_v7 = vpop.permute.xlu1 %601  ;;  %v1055_v8 = vpop.xlane.xlu0 %1054 }
 0x372   : > { %1921 = vpow2.f32 %v1065_v6  ;;  %605 = vst.msk [vmem:[#allocation4 + $0x8] sm:$0xff] %vm591_vm2, %v602_v7  ;;  %v1061_v9 = vsub.f32 %v967_v55, %v1055_v8 }
 0x374   : > { %v1067_v10 = vmul.f32 1.442695, %v1061_v9 }
 0x375   : > { %v1058_v11 = vpop.xlane.xlu0 %1057 }
 0x376   : > { %1923 = vpow2.f32 %v1067_v10  ;;  %v1062_v12 = vsub.f32 %v1043_v58, %v1058_v11 }
 0x378   : > { %v1069_v13 = vmul.f32 1.442695, %v1062_v12 }
 0x379   : > { %v740_v14 = vld [vmem:[#allocation4 + $0x8] sm:$0xff] }
 0x37a   : > { %1925 = vpow2.f32 %v1069_v13  ;;  %1756 = vmatpush3.msra.mxu1 %v740_v14 }
 0x37b   : > { %1765 = vmatprep.subr.mxu1 %v2178_v1 }
 0x37c   : > { %v1922_v15 = vpop.eup %1921 }
 0x37d   : > { %v1074_v16 = vsel %vm591_vm2, %v1922_v15, 0.0 }
 0x37e   : > { %1075 = vadd.xlane.f32.xlu0 %v1074_v16 }
 0x380   : > { %v1924_v17 = vpop.eup %1923 }
 0x381   : > { %v1077_v18 = vsel %vm591_vm2, %v1924_v17, 0.0 }
 0x382   : > { %1078 = vadd.xlane.f32.xlu1 %v1077_v18 }
 0x384   : > { %v1926_v19 = vpop.eup %1925 }
 0x385   : > { %v1080_v20 = vsel %vm591_vm2, %v1926_v19, 0.0 }
 0x386   : > { %1081 = vadd.xlane.f32.xlu0 %v1080_v20 }
 0x393   : > { %621 = vrot.lane.b32.xlu1 %v2535_v34, %s2181_s27 }
 0x39c   : > { %611 = vrot.lane.b32.xlu0 %v2535_v34, %s2179_s12  ;;  %s2687_s12 = sld [smem:[#allocation22_spill]] }
 0x3a2   : > { %v1073_v21 = vpop.xlane.xlu1 %1072  ;;  %v1655_v53 = vld [vmem:[%s2687_s12] ss:$0 sm:$0xff] }
 0x3a3   : > { %1927 = vrcp.f32 %v1073_v21 }
 0x3ad   : > { %v1928_v22 = vpop.eup %1927 }
 0x3ae   : > { %v1087_v23 = vmul.f32 %v1928_v22, %v1920_v2 }
 0x3b0   : > { %1753 = vmatmul.mubr.msk.f32.vlgmr.msra.gmra.mrb[4].mxu0 %vm591_vm2, %v1087_v23 }
 0x3b1   : > { %1762 = vmatprep.mubr.msk.f32.mxu0 %vm2177_vm0, %v2178_v1 }
 0x40b   : > { %v1076_v24 = vpop.xlane.xlu0 %1075 }
 0x40c   : > { %1929 = vrcp.f32 %v1076_v24 }
 0x40f   : > { %v1079_v25 = vpop.xlane.xlu1 %1078 }
 0x410   : > { %1931 = vrcp.f32 %v1079_v25 }
 0x413   : > { %v622_v26 = vpop.permute.xlu1 %621  ;;  %v1082_v27 = vpop.xlane.xlu0 %1081 }
 0x414   : > { %625 = vst.msk [vmem:[#allocation4 + $0x18] sm:$0xff] %vm591_vm2, %v622_v26  ;;  %1933 = vrcp.f32 %v1082_v27 }
 0x416   : > { %v1930_v28 = vpop.eup %1929 }
 0x417   : > { %v1088_v29 = vmul.f32 %v1930_v28, %v1922_v15  ;;  %v612_v30 = vpop.permute.xlu0 %611 }
 0x418   : > { %615 = vst.msk [vmem:[#allocation4 + $0x10] sm:$0xff] %vm591_vm2, %v612_v30 }
 0x419   : > { %1758 = vmatmul.mubr.msk.f32.vlgmr.msra.gmra.mrb[10].mxu1 %vm591_vm2, %v1088_v29 }
 0x41a   : > { %1767 = vmatprep.mubr.msk.f32.mxu1 %vm2177_vm0, %v2178_v1  ;;  %v1932_v32 = vpop.eup %1931 }
 0x41b   : > { %v742_v31 = vld [vmem:[#allocation4 + $0x18] sm:$0xff]  ;;  %v1089_v34 = vmul.f32 %v1932_v32, %v1924_v17 }
 0x41c   : > { %1766 = vmatpush3.msra.mxu1 %v742_v31 }
 0x41e   : > { %v1934_v33 = vpop.eup %1933 }
 0x41f   : > { %v1090_v35 = vmul.f32 %v1934_v33, %v1926_v19  ;;  %v741_v36 = vld [vmem:[#allocation4 + $0x10] sm:$0xff] }
 0x420   : > { %1761 = vmatpush3.msra.mxu0 %v741_v36 }
 0x421   : > { %1763 = vmatmul.mubr.msk.f32.vlgmr.msra.gmra.mrb[6].mxu0 %vm591_vm2, %v1089_v34  ;;  %1768 = vmatmul.mubr.msk.f32.vlgmr.msra.gmra.mrb[12].mxu1 %vm591_vm2, %v1090_v35 }
 0x422   : > { %1799 = vmatprep.subr.bf16.mxu0 %v2176_v0  ;;  %1778 = vmatprep.mubr.msk.f32.mxu0 %vm2177_vm0, %v2178_v1 }
 0x423   : > { %1801 = vmatpush3.bf16.msra.mxu0 %v1800_v41 }
 0x424   : > { %1802 = vmatprep.subr.bf16.mxu0 %v2176_v0 }
 0x427   : > { %1804 = vmatpush3.bf16.msra.mxu0 %v1803_v44 }
 0x483   : > { %v1160_v37 = vpop.f32.mrb[4].mxu0 }
 0x484   : > { %1383 = vst.msk [vmem:[#allocation5] sm:$0xff] %vm591_vm2, %v1160_v37  ;;  %v1754_v38 = vpop.f32.mrb[5].mxu0 }
 0x4ec   : > { %v1233_v45 = vpop.f32.mrb[10].mxu1 }
 0x4ed   : > { %1385 = vrot.lane.b32.xlu1 %v1233_v45, %s2182_s25  ;;  %v1759_v46 = vpop.f32.mrb[11].mxu1  ;;  %s2602_s25 = scalar_lea.hbm %s2688_s20, %s1658_s8 }
 0x4f4   : > { %v1306_v47 = vpop.f32.mrb[6].mxu0  ;;  %v1379_v1 = vpop.f32.mrb[12].mxu1 }
 0x4f5   : > { %1397 = vrot.lane.b32.xlu1 %v1379_v1, %s2183_s19  ;;  %v1769_v48 = vpop.f32.mrb[13].mxu1  ;;  %1391 = vrot.lane.b32.xlu0 %v1306_v47, %s2184_s22  ;;  %v1764_v49 = vpop.f32.mrb[7].mxu0  ;;  %s1489_s19 = scalar_lea.sflag [#allocation8], %s2474_s1  ;;  %s2081_s22 = sshll.u32 %s2185_s15, 4  ;;  %s2082_s22 = int_to_ptr.vmem [resolvable:$false] %s2081_s22 }
 0x4f6   : > { %s2083_s16 = scalar_lea.vmem %s2082_s22, 256  ;;  %p2084_p0 = scmp.lt.s32.totalorder %s2604_s26, %s2082_s22 }
 0x4f7   : > { %p2085_p7 = scmp.lt.s32.totalorder %s2083_s16, %s2077_s24 }
 0x4f9   : > { %p2086_p5 = por %p2085_p7, %p2084_p0 }
 0x4fb   : > { %p2087_p8 = pnand %p2086_p5, %p2080_p1 }
 0x55f   : > { %v1386_v50 = vpop.permute.xlu1 %1385 }
 0x560   : > { %1389 = vst.msk [vmem:[#allocation5] sm:$0xff] %vm1388_vm3, %v1386_v50 }
 0x567   : > { %v1398_v0 = vpop.permute.xlu1 %1397  ;;  %v1392_v51 = vpop.permute.xlu0 %1391 }
 0x568   : > { %1395 = vst.msk [vmem:[#allocation5] sm:$0xff] %vm1394_vm4, %v1392_v51 }
 0x569   : > { %1401 = vst.msk [vmem:[#allocation5] sm:$0xff] %vm1400_vm5, %v1398_v0 }
 0x570   : > { %v1402_v52 = vld [vmem:[#allocation5] sm:$0xff] }
 0x571   : > { %1779 = vmatmul.mubr.msk.f32.vlgmr.msra.gmra.mrb[8].mxu0 %vm436_vm1, %v1402_v52 }
 0x644   : > { %v1483_v54 = vpop.f32.mrb[8].mxu0 }
 0x645   : > { %v1484_v55 = vadd.f32 %v1655_v53, %v1483_v54  ;;  %v1780_v56 = vpop.f32.mrb[9].mxu0 }
 0x647   : > { %1487 = vst.msk [vmem:[%s419_s9] sm:$0xff] %vm436_vm1, %v1484_v55 }
 0x648   : > { %2090 = shalt.err (!%p2087_p8)
}
 0x649   : > { %s2091_s1 = scalar_lea.hbm %s2602_s25, 128  ;;  %s2095_s8 = scalar_lea.hbm %s2688_s20, 256 }
 0x64a   : > { %p2092_p3 = scmp.ne.s32.totalorder %s2602_s25, %s2091_s1  ;;  %p2096_p13 = scmp.lt.u32.totalorder %s2602_s25, %s2688_s20 }
 0x64b   : > { %p2097_p12 = scmp.lt.u32.totalorder %s2095_s8, %s2091_s1  ;;  %p2099_p2 = scmp.lt.u32.totalorder %s2091_s1, %s2602_s25 }
 0x64c   : > { %p2093_p11 = pnand %p2092_p3, %p2689_p9 }
 0x64d   : > { %p2098_p4 = por %p2097_p12, %p2096_p13 }
 0x64e   : > { %p2094_p6 = pneg %p2093_p11 }
 0x64f   : > { %p2100_p10 = por %p2099_p2, %p2098_p4 }
 0x651   : > { %p2101_p1 = pnand %p2100_p10, %p2094_p6 }
 0x653   : > { %2104 = shalt.err (!%p2101_p1)
}
 0x654   : > { %1823 = dma.vmem_to_hbm [thread:$0]  (%p2689_p9), %s2604_s26, 128, %s2602_s25, %s1489_s19  }
 0x655 PF: > { %s1515_s23 = sand.u32 1, %s2147_s30   ;;  %p2690_p0 = scmp.ne.s32.totalorder %s2682_s21, 0 }
 0x656   : > { %p2691_p7 = scmp.ge.s32.totalorder %s2167_s14, 2  ;;  %s1516_s24 = scalar_lea.sflag [#allocation8], %s1515_s23 }
 0x658   : > { %p1843_p5 = pnand %p2691_p7, %p2690_p0 }
 0x65a   : > { %2142 = dma.done.wait (!%p1843_p5), %s1516_s24, 128  }
 0x65b   : > { %2144 = vsyncadd (!%p1843_p5), %s1516_s24, 4294967168  ;;  %s27_s14 = sadd.s32 1, %s2167_s14   ;;  %s2692_s30 = smov %s2151_s10 }
 0x65c   : > { %p24_p8 = scmp.ge.s32.totalorder %s27_s14, 4   ;;  %s2693_s10 = smov %s2155_s11 }
 0x65d   : > { %s2694_s11 = smov %s2424_s29  ;;  %s2695_s12 = smov %s2163_s13 }
 0x65e   : > { %s2696_s13 = smov %s2698_s18  ;;  %26 = sbr.rel (!%p24_p8) target bundleno = 12 (0xc), region = 130 }
 0x665   :  { %1521 = vsyncpa [#allocation7], 1 }
 0x666   :  { %1523 = vsyncpa [#allocation7 + $0x1], 1 }
 0x667   :  { %1524 = vsyncpa [#allocation10], 1 }
 0x668   :  { %1525 = vsyncpa [#allocation13], 1 }
 0x669   :  { %1526 = vsyncpa [#allocation8], 1 }
 0x66a   :  { %1528 = vsyncpa [#allocation8 + $0x1], 1 }

</bundles_post_ra>
